<compile_context>
chip_gen: v6e
topology: v6e:2x2x1
jax: 0.10.0
libtpu: 0.0.40
codegen_flags: <defaults>
</compile_context>

<pallas_src>
import math

import jax
import jax.numpy as jnp
from jax.experimental import pallas as pl
from jax.experimental.pallas import tpu as pltpu

LN_EPS = 1e-5  # PyTorch nn.LayerNorm default eps


def sinusoidal_pos_embedding(seq_len, dim):
    """Standard interleaved sin/cos position table (assumed PositionEmbedding)."""
    pos = jnp.arange(seq_len, dtype=jnp.float32)[:, None]
    div = jnp.exp(jnp.arange(0, dim, 2, dtype=jnp.float32) * (-math.log(10000.0) / dim))
    pe = jnp.zeros((seq_len, dim), jnp.float32)
    pe = pe.at[:, 0::2].set(jnp.sin(pos * div))
    pe = pe.at[:, 1::2].set(jnp.cos(pos * div))
    return pe


def _layer_norm(x, w, b):
    mu = jnp.mean(x, axis=-1, keepdims=True)
    var = jnp.mean((x - mu) ** 2, axis=-1, keepdims=True)
    return (x - mu) * jax.lax.rsqrt(var + LN_EPS) * w + b


def block_layer_kernel(x0_ref,
                       ln1w_ref, ln1b_ref, wqkv_ref, bqkv_ref, wp_ref, bp_ref,
                       ln2w_ref, ln2b_ref, w1_ref, b1_ref, w2_ref, b2_ref,
                       o_ref, x_scr):
    """One (layer, batch-element) grid step; residual carried in VMEM scratch."""
    l = pl.program_id(0)   # layer index (outer, sequential carry)
    b = pl.program_id(1)   # batch element (inner; weights stay resident across b)
    bf = jnp.bfloat16

    _, T, C = x0_ref.shape
    H = wqkv_ref.shape[1]
    hd = wqkv_ref.shape[3] // 3

    # First layer: load the embedded input for this batch element into the carry.
    @pl.when(l == 0)
    def _():
        x_scr[b] = x0_ref[0]

    x = x_scr[b]                                                      # (T, C) f32

    # ---- causal cross-conditional self-attention (pre-LN) ----
    xn = _layer_norm(x, ln1w_ref[0], ln1b_ref[0]).astype(bf)          # (T, C)
    xn_h = jnp.broadcast_to(xn[None], (H, T, C))                      # head-batched view
    # head-batched fused QKV projection; 1/sqrt(hd) pre-folded into the Q weights/bias
    qkv = jnp.einsum('htc,hcd->htd', xn_h, wqkv_ref[0],
                     preferred_element_type=jnp.float32) + bqkv_ref[0]   # (H, T, 3hd)
    q = qkv[..., :hd].astype(bf)
    k = qkv[..., hd:2 * hd].astype(bf)
    v = qkv[..., 2 * hd:].astype(bf)

    att = jnp.einsum('hqd,hkd->hqk', q, k,
                     preferred_element_type=jnp.float32)              # (H, T, T)
    row = jax.lax.broadcasted_iota(jnp.int32, (T, T), 0)
    col = jax.lax.broadcasted_iota(jnp.int32, (T, T), 1)
    att = jnp.where((col <= row)[None], att, -jnp.inf)                # causal mask
    att = att - jnp.max(att, axis=-1, keepdims=True)                  # stable softmax
    p = jnp.exp(att)
    p = p / jnp.sum(p, axis=-1, keepdims=True)                        # exact normalize

    y = jnp.einsum('hqk,hkd->hqd', p.astype(bf), v,
                   preferred_element_type=jnp.float32)                # (H, T, hd)
    # per-head slice of Wp + head-sum  ==  concat(heads) @ Wp
    y_heads = jnp.einsum('hqd,hdc->hqc', y.astype(bf), wp_ref[0],
                         preferred_element_type=jnp.float32)          # (H, T, C)
    x = x + (jnp.sum(y_heads, axis=0) + bp_ref[0])                    # resid drop = id

    # ---- MLP (pre-LN) ----
    xn2 = _layer_norm(x, ln2w_ref[0], ln2b_ref[0]).astype(bf)
    h1 = jnp.dot(xn2, w1_ref[0], preferred_element_type=jnp.float32) + b1_ref[0]
    h1 = jax.nn.gelu(h1, approximate=True).astype(bf)                 # tanh GELU (EUP)
    h2 = jnp.dot(h1, w2_ref[0], preferred_element_type=jnp.float32) + b2_ref[0]
    x = x + h2                                                        # mlp drop = id

    x_scr[b] = x
    o_ref[0] = x.astype(o_ref.dtype)


def _layer_spec(arr):
    """Per-layer streamed weight: block (1, ...rest), index depends only on l."""
    nd = arr.ndim
    blk = (1,) + arr.shape[1:]
    return pl.BlockSpec(blk, lambda l, b, _nd=nd: (l,) + (0,) * (_nd - 1))


def prepare_kernel_params(params, n_head):
    """Fuse/reshape/cast PyTorch-style params into the kernel layout (host side)."""
    bf = jnp.bfloat16
    blocks = params['blocks']
    C = params['tok_emb'].shape[1]
    H = n_head
    hd = C // H
    scale = 1.0 / math.sqrt(hd)

    def per_head_cols(w):   # (C_in, C_out) -> (H, C_in, hd); head h = w[:, h*hd:(h+1)*hd]
        return jnp.transpose(w.reshape(C, H, hd), (1, 0, 2))

    def qkv_w(blk):         # (H, C, 3*hd), attention scale folded into the Q slice
        return jnp.concatenate([per_head_cols(blk['wq'] * scale),
                                per_head_cols(blk['wk']),
                                per_head_cols(blk['wv'])], axis=-1)

    def qkv_b(blk):         # (H, 1, 3*hd)
        return jnp.concatenate([(blk['bq'] * scale).reshape(H, hd),
                                blk['bk'].reshape(H, hd),
                                blk['bv'].reshape(H, hd)], axis=-1)[:, None, :]

    def stack(fn, dtype=jnp.float32):
        return jnp.stack([fn(blk) for blk in blocks], axis=0).astype(dtype)

    return dict(
        ln1_w=stack(lambda blk: blk['ln1_w'][None]),          # (L, 1, C)
        ln1_b=stack(lambda blk: blk['ln1_b'][None]),
        wqkv=stack(qkv_w, bf),                                 # (L, H, C, 3hd)
        bqkv=stack(qkv_b),                                     # (L, H, 1, 3hd)
        wp=stack(lambda blk: blk['wp'].reshape(H, hd, C), bf),  # (L, H, hd, C)
        bp=stack(lambda blk: blk['bp'][None]),                 # (L, 1, C)
        ln2_w=stack(lambda blk: blk['ln2_w'][None]),
        ln2_b=stack(lambda blk: blk['ln2_b'][None]),
        w1=stack(lambda blk: blk['w1'], bf),                   # (L, C, F)
        b1=stack(lambda blk: blk['b1'][None]),                 # (L, 1, F)
        w2=stack(lambda blk: blk['w2'], bf),                   # (L, F, C)
        b2=stack(lambda blk: blk['b2'][None]),                 # (L, 1, C)
    )


def cross_cond_trans_base(idx, clip_feature, params, n_head, block_size):
    B, t = idx.shape
    T = t + 1
    assert T <= block_size, "block size exhausted"
    C = params['tok_emb'].shape[1]
    assert C % n_head == 0
    L = len(params['blocks'])

    # Embedding front-end (gather + tiny f32 cond projection + pos add) in plain JAX,
    # per perf review: removes the (V, C) table / one-hot matmul from VMEM and keeps
    # clip_feature at full f32 precision.  Dropout is identity (eval mode).
    tok = jnp.take(params['tok_emb'], idx, axis=0)                                # (B, t, C)
    cond = (clip_feature.astype(jnp.float32) @ params['cond_w']
            + params['cond_b'])[:, None, :]                                       # (B, 1, C)
    x0 = jnp.concatenate([cond, tok], axis=1) + sinusoidal_pos_embedding(block_size, C)[:T]
    x0 = x0.astype(jnp.float32)                                                   # (B, T, C)

    kp = prepare_kernel_params(params, n_head)
    weight_args = (kp['ln1_w'], kp['ln1_b'], kp['wqkv'], kp['bqkv'], kp['wp'], kp['bp'],
                   kp['ln2_w'], kp['ln2_b'], kp['w1'], kp['b1'], kp['w2'], kp['b2'])

    in_specs = [pl.BlockSpec((1, T, C), lambda l, b: (b, 0, 0))] + \
               [_layer_spec(a) for a in weight_args]

    return pl.pallas_call(
        block_layer_kernel,
        out_shape=jax.ShapeDtypeStruct((B, T, C), jnp.float32),
        grid=(L, B),                      # layer OUTER: each layer's weights DMA'd once
        in_specs=in_specs,
        out_specs=pl.BlockSpec((1, T, C), lambda l, b: (b, 0, 0)),
        scratch_shapes=[pltpu.VMEM((B, T, C), jnp.float32)],   # residual carry
        compiler_params=pltpu.CompilerParams(
            # layer axis carries the residual (sequential); batch kept "arbitrary" too so
            # the carry scratch semantics are unambiguous across core partitioning.
            dimension_semantics=("arbitrary", "arbitrary"),
            vmem_limit_bytes=64 * 1024 * 1024),
    )(x0, *weight_args)


def init_params(key, num_vq, embed_dim, clip_dim, num_layers, fc_rate):
    """Synthetic params following CrossCondTransBase._init_weights (math (in,out) layout)."""
    def nrm(k, shape):
        return 0.02 * jax.random.normal(k, shape, dtype=jnp.float32)

    keys = jax.random.split(key, 2 + 6 * num_layers)
    blocks = []
    for l in range(num_layers):
        ks = keys[2 + 6 * l: 2 + 6 * (l + 1)]
        blocks.append(dict(
            ln1_w=jnp.ones((embed_dim,), jnp.float32), ln1_b=jnp.zeros((embed_dim,), jnp.float32),
            wq=nrm(ks[0], (embed_dim, embed_dim)), bq=jnp.zeros((embed_dim,), jnp.float32),
            wk=nrm(ks[1], (embed_dim, embed_dim)), bk=jnp.zeros((embed_dim,), jnp.float32),
            wv=nrm(ks[2], (embed_dim, embed_dim)), bv=jnp.zeros((embed_dim,), jnp.float32),
            wp=nrm(ks[3], (embed_dim, embed_dim)), bp=jnp.zeros((embed_dim,), jnp.float32),
            ln2_w=jnp.ones((embed_dim,), jnp.float32), ln2_b=jnp.zeros((embed_dim,), jnp.float32),
            w1=nrm(ks[4], (embed_dim, fc_rate * embed_dim)),
            b1=jnp.zeros((fc_rate * embed_dim,), jnp.float32),
            w2=nrm(ks[5], (fc_rate * embed_dim, embed_dim)),
            b2=jnp.zeros((embed_dim,), jnp.float32),
        ))
    return dict(
        tok_emb=nrm(keys[0], (num_vq + 2, embed_dim)),
        cond_w=nrm(keys[1], (clip_dim, embed_dim)),
        cond_b=jnp.zeros((embed_dim,), jnp.float32),
        blocks=blocks,
    )


def reference(idx, clip_feature, params, n_head, block_size):
    """Pure-JAX f32 mirror of the PyTorch forward (eval mode, exact erf GELU)."""
    def ln(x, w, b):
        mu = x.mean(-1, keepdims=True)
        var = ((x - mu) ** 2).mean(-1, keepdims=True)
        return (x - mu) / jnp.sqrt(var + LN_EPS) * w + b

    C = params['tok_emb'].shape[1]
    hd = C // n_head
    B, t = idx.shape
    tok = jnp.take(params['tok_emb'], idx, axis=0)                           # (B, t, C)
    cond = (clip_feature @ params['cond_w'] + params['cond_b'])[:, None, :]  # (B, 1, C)
    x = jnp.concatenate([cond, tok], axis=1)
    T = x.shape[1]
    x = x + sinusoidal_pos_embedding(block_size, C)[:T]

    for p in params['blocks']:
        xn = ln(x, p['ln1_w'], p['ln1_b'])
        q = (xn @ p['wq'] + p['bq']).reshape(B, T, n_head, hd).transpose(0, 2, 1, 3)
        k = (xn @ p['wk'] + p['bk']).reshape(B, T, n_head, hd).transpose(0, 2, 1, 3)
        v = (xn @ p['wv'] + p['bv']).reshape(B, T, n_head, hd).transpose(0, 2, 1, 3)
        att = jnp.einsum('bhqd,bhkd->bhqk', q, k) / math.sqrt(hd)
        mask = jnp.tril(jnp.ones((T, T)))
        att = jnp.where(mask == 0, -jnp.inf, att)
        att = jax.nn.softmax(att, axis=-1)
        y = jnp.einsum('bhqk,bhkd->bhqd', att, v).transpose(0, 2, 1, 3).reshape(B, T, C)
        x = x + (y @ p['wp'] + p['bp'])
        xn2 = ln(x, p['ln2_w'], p['ln2_b'])
        h1 = jax.nn.gelu(xn2 @ p['w1'] + p['b1'], approximate=False)
        x = x + (h1 @ p['w2'] + p['b2'])
    return x


if __name__ == "__main__":
    # Small shapes consistent with the module: embed_dim % 8 == 0, T = t+1 <= block_size,
    # cond_emb input is hardwired to 768 features.
    B, t = 2, 7
    num_vq, embed_dim, clip_dim = 64, 64, 768
    block_size, num_layers, n_head, fc_rate = 16, 2, 4, 4

    key = jax.random.PRNGKey(0)
    k_idx, k_clip, k_par = jax.random.split(key, 3)
    idx = jax.random.randint(k_idx, (B, t), 0, num_vq + 2, dtype=jnp.int32)
    clip_feature = jax.random.normal(k_clip, (B, clip_dim), dtype=jnp.float32)
    params = init_params(k_par, num_vq, embed_dim, clip_dim, num_layers, fc_rate)

    out = cross_cond_trans_base(idx, clip_feature, params, n_head, block_size)
    out = jax.block_until_ready(out)
    assert out.shape == (B, t + 1, embed_dim), out.shape

    ref = jax.block_until_ready(reference(idx, clip_feature, params, n_head, block_size))
    max_diff = jnp.max(jnp.abs(out - ref))
    # bf16 MXU operands + tanh GELU vs f32 / erf reference
    assert jnp.allclose(out, ref, rtol=3e-2, atol=3e-2), f"max abs diff {max_diff}"

    print("KERNEL_OK")
</pallas_src>

<mosaic_0001>
module attributes {stable_mosaic.version = 11 : i64} {
  func.func @block_layer_kernel(%arg0: i32, %arg1: i32, %arg2: memref<1x8x64xf32, #tpu.memory_space<vmem>>, %arg3: memref<1x1x64xf32, #tpu.memory_space<vmem>>, %arg4: memref<1x1x64xf32, #tpu.memory_space<vmem>>, %arg5: memref<1x4x64x48xbf16, #tpu.memory_space<vmem>>, %arg6: memref<1x4x1x48xf32, #tpu.memory_space<vmem>>, %arg7: memref<1x4x16x64xbf16, #tpu.memory_space<vmem>>, %arg8: memref<1x1x64xf32, #tpu.memory_space<vmem>>, %arg9: memref<1x1x64xf32, #tpu.memory_space<vmem>>, %arg10: memref<1x1x64xf32, #tpu.memory_space<vmem>>, %arg11: memref<1x64x256xbf16, #tpu.memory_space<vmem>>, %arg12: memref<1x1x256xf32, #tpu.memory_space<vmem>>, %arg13: memref<1x256x64xbf16, #tpu.memory_space<vmem>>, %arg14: memref<1x1x64xf32, #tpu.memory_space<vmem>>, %arg15: memref<1x8x64xf32, #tpu.memory_space<vmem>>, %arg16: memref<2x8x64xf32, #tpu.memory_space<vmem>>) attributes {dimension_semantics = [#tpu.dimension_semantics<arbitrary>, #tpu.dimension_semantics<arbitrary>], iteration_bounds = array<i64: 2, 2>, scalar_prefetch = 0 : i64, scratch_operands = 1 : i64, tpu.core_type = #tpu.core_type<tc>, window_params = [{transform_indices = @transform_0, window_bounds = array<i64: 1, 8, 64>}, {transform_indices = @transform_1, window_bounds = array<i64: 1, 1, 64>}, {transform_indices = @transform_2, window_bounds = array<i64: 1, 1, 64>}, {transform_indices = @transform_3, window_bounds = array<i64: 1, 4, 64, 48>}, {transform_indices = @transform_4, window_bounds = array<i64: 1, 4, 1, 48>}, {transform_indices = @transform_5, window_bounds = array<i64: 1, 4, 16, 64>}, {transform_indices = @transform_6, window_bounds = array<i64: 1, 1, 64>}, {transform_indices = @transform_7, window_bounds = array<i64: 1, 1, 64>}, {transform_indices = @transform_8, window_bounds = array<i64: 1, 1, 64>}, {transform_indices = @transform_9, window_bounds = array<i64: 1, 64, 256>}, {transform_indices = @transform_10, window_bounds = array<i64: 1, 1, 256>}, {transform_indices = @transform_11, window_bounds = array<i64: 1, 256, 64>}, {transform_indices = @transform_12, window_bounds = array<i64: 1, 1, 64>}, {transform_indices = @transform_13, window_bounds = array<i64: 1, 8, 64>}]} {
    %c0_i32 = arith.constant 0 : i32
    %0 = arith.cmpi eq, %arg0, %c0_i32 : i32
    %1 = arith.extui %0 : i1 to i32
    %c0_i32_0 = arith.constant 0 : i32
    %2 = arith.cmpi ne, %1, %c0_i32_0 : i32
    scf.if %2 {
      %c0_69 = arith.constant 0 : index
      %c0_70 = arith.constant 0 : index
      %c0_71 = arith.constant 0 : index
      %142 = vector.load %arg2[%c0_69, %c0_70, %c0_71] : memref<1x8x64xf32, #tpu.memory_space<vmem>>, vector<1x8x64xf32>
      %143 = vector.shape_cast %142 : vector<1x8x64xf32> to vector<8x64xf32>
      %144 = arith.index_cast %arg1 : i32 to index
      %c0_72 = arith.constant 0 : index
      %c0_73 = arith.constant 0 : index
      %145 = vector.load %arg16[%144, %c0_72, %c0_73] : memref<2x8x64xf32, #tpu.memory_space<vmem>>, vector<1x8x64xf32>
      %146 = vector.shape_cast %145 : vector<1x8x64xf32> to vector<8x64xf32>
      %147 = vector.shape_cast %143 : vector<8x64xf32> to vector<1x8x64xf32>
      tpu.vector_store %arg16[%144, %c0_72, %c0_73], %147 {strides = array<i32>} : memref<2x8x64xf32, #tpu.memory_space<vmem>>, vector<1x8x64xf32>,
    } else {
    }
    %3 = arith.index_cast %arg1 : i32 to index
    %c0 = arith.constant 0 : index
    %c0_1 = arith.constant 0 : index
    %4 = vector.load %arg16[%3, %c0, %c0_1] : memref<2x8x64xf32, #tpu.memory_space<vmem>>, vector<1x8x64xf32>
    %5 = vector.shape_cast %4 : vector<1x8x64xf32> to vector<8x64xf32>
    %c0_2 = arith.constant 0 : index
    %c0_3 = arith.constant 0 : index
    %c0_4 = arith.constant 0 : index
    %6 = vector.load %arg3[%c0_2, %c0_3, %c0_4] : memref<1x1x64xf32, #tpu.memory_space<vmem>>, vector<1x1x64xf32>
    %7 = vector.shape_cast %6 : vector<1x1x64xf32> to vector<1x64xf32>
    %c0_5 = arith.constant 0 : index
    %c0_6 = arith.constant 0 : index
    %c0_7 = arith.constant 0 : index
    %8 = vector.load %arg4[%c0_5, %c0_6, %c0_7] : memref<1x1x64xf32, #tpu.memory_space<vmem>>, vector<1x1x64xf32>
    %9 = vector.shape_cast %8 : vector<1x1x64xf32> to vector<1x64xf32>
    %cst = arith.constant dense<0.000000e+00> : vector<8xf32>
    %10 = vector.multi_reduction <add>, %5, %cst [1] : vector<8x64xf32> to vector<8xf32>
    %11 = vector.shape_cast %10 : vector<8xf32> to vector<8x1xf32>
    %cst_8 = arith.constant 6.400000e+01 : f32
    %12 = vector.broadcast %cst_8 : f32 to vector<8x1xf32>
    %13 = arith.divf %11, %12 : vector<8x1xf32>
    %14 = vector.broadcast %13 : vector<8x1xf32> to vector<8x64xf32>
    %15 = arith.subf %5, %14 : vector<8x64xf32>
    %16 = arith.mulf %15, %15 : vector<8x64xf32>
    %cst_9 = arith.constant dense<0.000000e+00> : vector<8xf32>
    %17 = vector.multi_reduction <add>, %16, %cst_9 [1] : vector<8x64xf32> to vector<8xf32>
    %18 = vector.shape_cast %17 : vector<8xf32> to vector<8x1xf32>
    %cst_10 = arith.constant 6.400000e+01 : f32
    %19 = vector.broadcast %cst_10 : f32 to vector<8x1xf32>
    %20 = arith.divf %18, %19 : vector<8x1xf32>
    %21 = vector.broadcast %13 : vector<8x1xf32> to vector<8x64xf32>
    %22 = arith.subf %5, %21 : vector<8x64xf32>
    %cst_11 = arith.constant 9.99999974E-6 : f32
    %23 = vector.broadcast %cst_11 : f32 to vector<8x1xf32>
    %24 = arith.addf %20, %23 : vector<8x1xf32>
    %25 = math.rsqrt %24 : vector<8x1xf32>
    %26 = vector.broadcast %25 : vector<8x1xf32> to vector<8x64xf32>
    %27 = arith.mulf %22, %26 : vector<8x64xf32>
    %28 = vector.broadcast %7 : vector<1x64xf32> to vector<8x64xf32>
    %29 = arith.mulf %27, %28 : vector<8x64xf32>
    %30 = vector.broadcast %9 : vector<1x64xf32> to vector<8x64xf32>
    %31 = arith.addf %29, %30 : vector<8x64xf32>
    %32 = arith.truncf %31 : vector<8x64xf32> to vector<8x64xbf16>
    %33 = vector.shape_cast %32 : vector<8x64xbf16> to vector<1x8x64xbf16>
    %34 = vector.shape_cast %33 : vector<1x8x64xbf16> to vector<1x8x64xbf16>
    %35 = vector.broadcast %34 : vector<1x8x64xbf16> to vector<4x8x64xbf16>
    %c0_12 = arith.constant 0 : index
    %c0_13 = arith.constant 0 : index
    %c0_14 = arith.constant 0 : index
    %c0_15 = arith.constant 0 : index
    %36 = vector.load %arg5[%c0_12, %c0_13, %c0_14, %c0_15] : memref<1x4x64x48xbf16, #tpu.memory_space<vmem>>, vector<1x4x64x48xbf16>
    %37 = vector.shape_cast %36 : vector<1x4x64x48xbf16> to vector<4x64x48xbf16>
    "tpu.trace_start"() <{level = 10 : i32, message = "htc,hcd->htd"}> : () -> ()
    %cst_16 = arith.constant dense<0.000000e+00> : vector<4x8x48xf32>
    %38 = tpu.matmul %35, %37, %cst_16 {dimension_numbers = #tpu.dot_dimension_numbers<[2], [1], [1], [2], [0, 0, 0, 1, 1, 2], [0], [0]>} : vector<4x8x64xbf16>, vector<4x64x48xbf16>, vector<4x8x48xf32> -> vector<4x8x48xf32>
    "tpu.trace_stop"() : () -> ()
    %c0_17 = arith.constant 0 : index
    %c0_18 = arith.constant 0 : index
    %c0_19 = arith.constant 0 : index
    %c0_20 = arith.constant 0 : index
    %39 = vector.load %arg6[%c0_17, %c0_18, %c0_19, %c0_20] : memref<1x4x1x48xf32, #tpu.memory_space<vmem>>, vector<1x4x1x48xf32>
    %40 = vector.shape_cast %39 : vector<1x4x1x48xf32> to vector<4x1x48xf32>
    %41 = vector.broadcast %40 : vector<4x1x48xf32> to vector<4x8x48xf32>
    %42 = arith.addf %38, %41 : vector<4x8x48xf32>
    %43 = vector.extract_strided_slice %42 {offsets = [0, 0, 0], sizes = [4, 8, 16], strides = [1, 1, 1]} : vector<4x8x48xf32> to vector<4x8x16xf32>
    %44 = arith.truncf %43 : vector<4x8x16xf32> to vector<4x8x16xbf16>
    %45 = vector.extract_strided_slice %42 {offsets = [0, 0, 16], sizes = [4, 8, 16], strides = [1, 1, 1]} : vector<4x8x48xf32> to vector<4x8x16xf32>
    %46 = arith.truncf %45 : vector<4x8x16xf32> to vector<4x8x16xbf16>
    %47 = vector.extract_strided_slice %42 {offsets = [0, 0, 32], sizes = [4, 8, 16], strides = [1, 1, 1]} : vector<4x8x48xf32> to vector<4x8x16xf32>
    %48 = arith.truncf %47 : vector<4x8x16xf32> to vector<4x8x16xbf16>
    "tpu.trace_start"() <{level = 10 : i32, message = "hqd,hkd->hqk"}> : () -> ()
    %cst_21 = arith.constant dense<0.000000e+00> : vector<4x8x8xf32>
    %49 = tpu.matmul %44, %46, %cst_21 {dimension_numbers = #tpu.dot_dimension_numbers<[2], [2], [1], [1], [0, 0, 0, 1, 1, 1], [0], [0]>} : vector<4x8x16xbf16>, vector<4x8x16xbf16>, vector<4x8x8xf32> -> vector<4x8x8xf32>
    "tpu.trace_stop"() : () -> ()
    %50 = tpu.iota {dimensions = array<i32: 0>} : vector<8x8xi32>
    %51 = tpu.iota {dimensions = array<i32: 1>} : vector<8x8xi32>
    %52 = arith.cmpi sle, %51, %50 : vector<8x8xi32>
    %53 = vector.shape_cast %52 : vector<8x8xi1> to vector<1x8x8xi1>
    %cst_22 = arith.constant 0xFF800000 : f32
    %54 = vector.shape_cast %53 : vector<1x8x8xi1> to vector<1x8x8xi1>
    %55 = vector.broadcast %54 : vector<1x8x8xi1> to vector<4x8x8xi1>
    %56 = vector.broadcast %cst_22 : f32 to vector<4x8x8xf32>
    %57 = arith.select %55, %49, %56 : vector<4x8x8xi1>, vector<4x8x8xf32>
    %cst_23 = arith.constant dense<0xFF800000> : vector<4x8xf32>
    %58 = vector.multi_reduction <maximumf>, %57, %cst_23 [2] : vector<4x8x8xf32> to vector<4x8xf32>
    %59 = vector.shape_cast %58 : vector<4x8xf32> to vector<4x8x1xf32>
    %60 = vector.broadcast %59 : vector<4x8x1xf32> to vector<4x8x8xf32>
    %61 = arith.subf %57, %60 : vector<4x8x8xf32>
    %62 = math.exp %61 : vector<4x8x8xf32>
    %cst_24 = arith.constant dense<0.000000e+00> : vector<4x8xf32>
    %63 = vector.multi_reduction <add>, %62, %cst_24 [2] : vector<4x8x8xf32> to vector<4x8xf32>
    %64 = vector.shape_cast %63 : vector<4x8xf32> to vector<4x8x1xf32>
    %65 = vector.broadcast %64 : vector<4x8x1xf32> to vector<4x8x8xf32>
    %66 = arith.divf %62, %65 : vector<4x8x8xf32>
    %67 = arith.truncf %66 : vector<4x8x8xf32> to vector<4x8x8xbf16>
    "tpu.trace_start"() <{level = 10 : i32, message = "hqk,hkd->hqd"}> : () -> ()
    %cst_25 = arith.constant dense<0.000000e+00> : vector<4x8x16xf32>
    %68 = tpu.matmul %67, %48, %cst_25 {dimension_numbers = #tpu.dot_dimension_numbers<[2], [1], [1], [2], [0, 0, 0, 1, 1, 2], [0], [0]>} : vector<4x8x8xbf16>, vector<4x8x16xbf16>, vector<4x8x16xf32> -> vector<4x8x16xf32>
    "tpu.trace_stop"() : () -> ()
    %69 = arith.truncf %68 : vector<4x8x16xf32> to vector<4x8x16xbf16>
    %c0_26 = arith.constant 0 : index
    %c0_27 = arith.constant 0 : index
    %c0_28 = arith.constant 0 : index
    %c0_29 = arith.constant 0 : index
    %70 = vector.load %arg7[%c0_26, %c0_27, %c0_28, %c0_29] : memref<1x4x16x64xbf16, #tpu.memory_space<vmem>>, vector<1x4x16x64xbf16>
    %71 = vector.shape_cast %70 : vector<1x4x16x64xbf16> to vector<4x16x64xbf16>
    "tpu.trace_start"() <{level = 10 : i32, message = "hqd,hdc->hqc"}> : () -> ()
    %cst_30 = arith.constant dense<0.000000e+00> : vector<4x8x64xf32>
    %72 = tpu.matmul %69, %71, %cst_30 {dimension_numbers = #tpu.dot_dimension_numbers<[2], [1], [1], [2], [0, 0, 0, 1, 1, 2], [0], [0]>} : vector<4x8x16xbf16>, vector<4x16x64xbf16>, vector<4x8x64xf32> -> vector<4x8x64xf32>
    "tpu.trace_stop"() : () -> ()
    %cst_31 = arith.constant dense<0.000000e+00> : vector<8x64xf32>
    %73 = vector.multi_reduction <add>, %72, %cst_31 [0] : vector<4x8x64xf32> to vector<8x64xf32>
    %c0_32 = arith.constant 0 : index
    %c0_33 = arith.constant 0 : index
    %c0_34 = arith.constant 0 : index
    %74 = vector.load %arg8[%c0_32, %c0_33, %c0_34] : memref<1x1x64xf32, #tpu.memory_space<vmem>>, vector<1x1x64xf32>
    %75 = vector.shape_cast %74 : vector<1x1x64xf32> to vector<1x64xf32>
    %76 = vector.broadcast %75 : vector<1x64xf32> to vector<8x64xf32>
    %77 = arith.addf %73, %76 : vector<8x64xf32>
    %78 = arith.addf %5, %77 : vector<8x64xf32>
    %c0_35 = arith.constant 0 : index
    %c0_36 = arith.constant 0 : index
    %c0_37 = arith.constant 0 : index
    %79 = vector.load %arg9[%c0_35, %c0_36, %c0_37] : memref<1x1x64xf32, #tpu.memory_space<vmem>>, vector<1x1x64xf32>
    %80 = vector.shape_cast %79 : vector<1x1x64xf32> to vector<1x64xf32>
    %c0_38 = arith.constant 0 : index
    %c0_39 = arith.constant 0 : index
    %c0_40 = arith.constant 0 : index
    %81 = vector.load %arg10[%c0_38, %c0_39, %c0_40] : memref<1x1x64xf32, #tpu.memory_space<vmem>>, vector<1x1x64xf32>
    %82 = vector.shape_cast %81 : vector<1x1x64xf32> to vector<1x64xf32>
    %cst_41 = arith.constant dense<0.000000e+00> : vector<8xf32>
    %83 = vector.multi_reduction <add>, %78, %cst_41 [1] : vector<8x64xf32> to vector<8xf32>
    %84 = vector.shape_cast %83 : vector<8xf32> to vector<8x1xf32>
    %cst_42 = arith.constant 6.400000e+01 : f32
    %85 = vector.broadcast %cst_42 : f32 to vector<8x1xf32>
    %86 = arith.divf %84, %85 : vector<8x1xf32>
    %87 = vector.broadcast %86 : vector<8x1xf32> to vector<8x64xf32>
    %88 = arith.subf %78, %87 : vector<8x64xf32>
    %89 = arith.mulf %88, %88 : vector<8x64xf32>
    %cst_43 = arith.constant dense<0.000000e+00> : vector<8xf32>
    %90 = vector.multi_reduction <add>, %89, %cst_43 [1] : vector<8x64xf32> to vector<8xf32>
    %91 = vector.shape_cast %90 : vector<8xf32> to vector<8x1xf32>
    %cst_44 = arith.constant 6.400000e+01 : f32
    %92 = vector.broadcast %cst_44 : f32 to vector<8x1xf32>
    %93 = arith.divf %91, %92 : vector<8x1xf32>
    %94 = vector.broadcast %86 : vector<8x1xf32> to vector<8x64xf32>
    %95 = arith.subf %78, %94 : vector<8x64xf32>
    %cst_45 = arith.constant 9.99999974E-6 : f32
    %96 = vector.broadcast %cst_45 : f32 to vector<8x1xf32>
    %97 = arith.addf %93, %96 : vector<8x1xf32>
    %98 = math.rsqrt %97 : vector<8x1xf32>
    %99 = vector.broadcast %98 : vector<8x1xf32> to vector<8x64xf32>
    %100 = arith.mulf %95, %99 : vector<8x64xf32>
    %101 = vector.broadcast %80 : vector<1x64xf32> to vector<8x64xf32>
    %102 = arith.mulf %100, %101 : vector<8x64xf32>
    %103 = vector.broadcast %82 : vector<1x64xf32> to vector<8x64xf32>
    %104 = arith.addf %102, %103 : vector<8x64xf32>
    %105 = arith.truncf %104 : vector<8x64xf32> to vector<8x64xbf16>
    %c0_46 = arith.constant 0 : index
    %c0_47 = arith.constant 0 : index
    %c0_48 = arith.constant 0 : index
    %106 = vector.load %arg11[%c0_46, %c0_47, %c0_48] : memref<1x64x256xbf16, #tpu.memory_space<vmem>>, vector<1x64x256xbf16>
    %107 = vector.shape_cast %106 : vector<1x64x256xbf16> to vector<64x256xbf16>
    %cst_49 = arith.constant dense<0.000000e+00> : vector<8x256xf32>
    %108 = tpu.matmul %105, %107, %cst_49 {dimension_numbers = #tpu.dot_dimension_numbers<[1], [0], [0], [1], [0, 0, 1, 1], [], []>} : vector<8x64xbf16>, vector<64x256xbf16>, vector<8x256xf32> -> vector<8x256xf32>
    %c0_50 = arith.constant 0 : index
    %c0_51 = arith.constant 0 : index
    %c0_52 = arith.constant 0 : index
    %109 = vector.load %arg12[%c0_50, %c0_51, %c0_52] : memref<1x1x256xf32, #tpu.memory_space<vmem>>, vector<1x1x256xf32>
    %110 = vector.shape_cast %109 : vector<1x1x256xf32> to vector<1x256xf32>
    %111 = vector.broadcast %110 : vector<1x256xf32> to vector<8x256xf32>
    %112 = arith.addf %108, %111 : vector<8x256xf32>
    %113 = arith.mulf %112, %112 : vector<8x256xf32>
    %114 = arith.mulf %112, %113 : vector<8x256xf32>
    %cst_53 = arith.constant 4.471500e-02 : f32
    %115 = vector.broadcast %cst_53 : f32 to vector<8x256xf32>
    %116 = arith.mulf %115, %114 : vector<8x256xf32>
    %117 = arith.addf %112, %116 : vector<8x256xf32>
    %cst_54 = arith.constant 0.797884583 : f32
    %118 = vector.broadcast %cst_54 : f32 to vector<8x256xf32>
    %119 = arith.mulf %118, %117 : vector<8x256xf32>
    %120 = math.tanh %119 : vector<8x256xf32>
    %cst_55 = arith.constant 1.000000e+00 : f32
    %121 = vector.broadcast %cst_55 : f32 to vector<8x256xf32>
    %122 = arith.addf %121, %120 : vector<8x256xf32>
    %cst_56 = arith.constant 5.000000e-01 : f32
    %123 = vector.broadcast %cst_56 : f32 to vector<8x256xf32>
    %124 = arith.mulf %123, %122 : vector<8x256xf32>
    %125 = arith.mulf %112, %124 : vector<8x256xf32>
    %126 = arith.truncf %125 : vector<8x256xf32> to vector<8x256xbf16>
    %c0_57 = arith.constant 0 : index
    %c0_58 = arith.constant 0 : index
    %c0_59 = arith.constant 0 : index
    %127 = vector.load %arg13[%c0_57, %c0_58, %c0_59] : memref<1x256x64xbf16, #tpu.memory_space<vmem>>, vector<1x256x64xbf16>
    %128 = vector.shape_cast %127 : vector<1x256x64xbf16> to vector<256x64xbf16>
    %cst_60 = arith.constant dense<0.000000e+00> : vector<8x64xf32>
    %129 = tpu.matmul %126, %128, %cst_60 {dimension_numbers = #tpu.dot_dimension_numbers<[1], [0], [0], [1], [0, 0, 1, 1], [], []>} : vector<8x256xbf16>, vector<256x64xbf16>, vector<8x64xf32> -> vector<8x64xf32>
    %c0_61 = arith.constant 0 : index
    %c0_62 = arith.constant 0 : index
    %c0_63 = arith.constant 0 : index
    %130 = vector.load %arg14[%c0_61, %c0_62, %c0_63] : memref<1x1x64xf32, #tpu.memory_space<vmem>>, vector<1x1x64xf32>
    %131 = vector.shape_cast %130 : vector<1x1x64xf32> to vector<1x64xf32>
    %132 = vector.broadcast %131 : vector<1x64xf32> to vector<8x64xf32>
    %133 = arith.addf %129, %132 : vector<8x64xf32>
    %134 = arith.addf %78, %133 : vector<8x64xf32>
    %135 = arith.index_cast %arg1 : i32 to index
    %c0_64 = arith.constant 0 : index
    %c0_65 = arith.constant 0 : index
    %136 = vector.load %arg16[%135, %c0_64, %c0_65] : memref<2x8x64xf32, #tpu.memory_space<vmem>>, vector<1x8x64xf32>
    %137 = vector.shape_cast %136 : vector<1x8x64xf32> to vector<8x64xf32>
    %138 = vector.shape_cast %134 : vector<8x64xf32> to vector<1x8x64xf32>
    tpu.vector_store %arg16[%135, %c0_64, %c0_65], %138 {strides = array<i32>} : memref<2x8x64xf32, #tpu.memory_space<vmem>>, vector<1x8x64xf32>,
    %c0_66 = arith.constant 0 : index
    %c0_67 = arith.constant 0 : index
    %c0_68 = arith.constant 0 : index
    %139 = vector.load %arg15[%c0_66, %c0_67, %c0_68] : memref<1x8x64xf32, #tpu.memory_space<vmem>>, vector<1x8x64xf32>
    %140 = vector.shape_cast %139 : vector<1x8x64xf32> to vector<8x64xf32>
    %141 = vector.shape_cast %134 : vector<8x64xf32> to vector<1x8x64xf32>
    tpu.vector_store %arg15[%c0_66, %c0_67, %c0_68], %141 {strides = array<i32>} : memref<1x8x64xf32, #tpu.memory_space<vmem>>, vector<1x8x64xf32>,
    return
  }
  func.func @transform_0(%arg0: i32, %arg1: i32) -> (i32, i32, i32) {
    %c0_i32 = arith.constant 0 : i32
    %c0_i32_0 = arith.constant 0 : i32
    %c0_i32_1 = arith.constant 0 : i32
    return %arg1, %c0_i32, %c0_i32_0 : i32, i32, i32
  }
  func.func @transform_1(%arg0: i32, %arg1: i32) -> (i32, i32, i32) {
    %c0_i32 = arith.constant 0 : i32
    %c0_i32_0 = arith.constant 0 : i32
    %c0_i32_1 = arith.constant 0 : i32
    return %arg0, %c0_i32, %c0_i32_0 : i32, i32, i32
  }
  func.func @transform_2(%arg0: i32, %arg1: i32) -> (i32, i32, i32) {
    %c0_i32 = arith.constant 0 : i32
    %c0_i32_0 = arith.constant 0 : i32
    %c0_i32_1 = arith.constant 0 : i32
    return %arg0, %c0_i32, %c0_i32_0 : i32, i32, i32
  }
  func.func @transform_3(%arg0: i32, %arg1: i32) -> (i32, i32, i32, i32) {
    %c0_i32 = arith.constant 0 : i32
    %c0_i32_0 = arith.constant 0 : i32
    %c0_i32_1 = arith.constant 0 : i32
    %c0_i32_2 = arith.constant 0 : i32
    return %arg0, %c0_i32, %c0_i32_0, %c0_i32_1 : i32, i32, i32, i32
  }
  func.func @transform_4(%arg0: i32, %arg1: i32) -> (i32, i32, i32, i32) {
    %c0_i32 = arith.constant 0 : i32
    %c0_i32_0 = arith.constant 0 : i32
    %c0_i32_1 = arith.constant 0 : i32
    %c0_i32_2 = arith.constant 0 : i32
    return %arg0, %c0_i32, %c0_i32_0, %c0_i32_1 : i32, i32, i32, i32
  }
  func.func @transform_5(%arg0: i32, %arg1: i32) -> (i32, i32, i32, i32) {
    %c0_i32 = arith.constant 0 : i32
    %c0_i32_0 = arith.constant 0 : i32
    %c0_i32_1 = arith.constant 0 : i32
    %c0_i32_2 = arith.constant 0 : i32
    return %arg0, %c0_i32, %c0_i32_0, %c0_i32_1 : i32, i32, i32, i32
  }
  func.func @transform_6(%arg0: i32, %arg1: i32) -> (i32, i32, i32) {
    %c0_i32 = arith.constant 0 : i32
    %c0_i32_0 = arith.constant 0 : i32
    %c0_i32_1 = arith.constant 0 : i32
    return %arg0, %c0_i32, %c0_i32_0 : i32, i32, i32
  }
  func.func @transform_7(%arg0: i32, %arg1: i32) -> (i32, i32, i32) {
    %c0_i32 = arith.constant 0 : i32
    %c0_i32_0 = arith.constant 0 : i32
    %c0_i32_1 = arith.constant 0 : i32
    return %arg0, %c0_i32, %c0_i32_0 : i32, i32, i32
  }
  func.func @transform_8(%arg0: i32, %arg1: i32) -> (i32, i32, i32) {
    %c0_i32 = arith.constant 0 : i32
    %c0_i32_0 = arith.constant 0 : i32
    %c0_i32_1 = arith.constant 0 : i32
    return %arg0, %c0_i32, %c0_i32_0 : i32, i32, i32
  }
  func.func @transform_9(%arg0: i32, %arg1: i32) -> (i32, i32, i32) {
    %c0_i32 = arith.constant 0 : i32
    %c0_i32_0 = arith.constant 0 : i32
    %c0_i32_1 = arith.constant 0 : i32
    return %arg0, %c0_i32, %c0_i32_0 : i32, i32, i32
  }
  func.func @transform_10(%arg0: i32, %arg1: i32) -> (i32, i32, i32) {
    %c0_i32 = arith.constant 0 : i32
    %c0_i32_0 = arith.constant 0 : i32
    %c0_i32_1 = arith.constant 0 : i32
    return %arg0, %c0_i32, %c0_i32_0 : i32, i32, i32
  }
  func.func @transform_11(%arg0: i32, %arg1: i32) -> (i32, i32, i32) {
    %c0_i32 = arith.constant 0 : i32
    %c0_i32_0 = arith.constant 0 : i32
    %c0_i32_1 = arith.constant 0 : i32
    return %arg0, %c0_i32, %c0_i32_0 : i32, i32, i32
  }
  func.func @transform_12(%arg0: i32, %arg1: i32) -> (i32, i32, i32) {
    %c0_i32 = arith.constant 0 : i32
    %c0_i32_0 = arith.constant 0 : i32
    %c0_i32_1 = arith.constant 0 : i32
    return %arg0, %c0_i32, %c0_i32_0 : i32, i32, i32
  }
  func.func @transform_13(%arg0: i32, %arg1: i32) -> (i32, i32, i32) {
    %c0_i32 = arith.constant 0 : i32
    %c0_i32_0 = arith.constant 0 : i32
    %c0_i32_1 = arith.constant 0 : i32
    return %arg1, %c0_i32, %c0_i32_0 : i32, i32, i32
  }
}

</mosaic_0001>

<bundles_post_ra>
// kernel: tpu_custom_call.1
= control target key start
LH: loop header
LB: loop body
LE: loop exit
PB: predicated region body
PF: predicated region fallthrough
CT: control target
= control target key end

     0   :  { %s3272_s0 = inlined_call_operand.vmem [shape: f32[2,8,64], index: 0, kind: input, shape index: {}]   ;;  %s3273_s1 = inlined_call_operand.vmem [shape: f32[2,1,64], index: 1, kind: input, shape index: {}]   ;;  %s3274_s2 = inlined_call_operand.vmem [shape: f32[2,1,64], index: 2, kind: input, shape index: {}]   ;;  %s3275_s3 = inlined_call_operand.vmem [shape: bf16[2,4,64,48], index: 3, kind: input, shape index: {}]   ;;  %s3276_s4 = inlined_call_operand.vmem [shape: f32[2,4,1,48], index: 4, kind: input, shape index: {}]   ;;  %s3277_s5 = inlined_call_operand.vmem [shape: bf16[2,4,16,64], index: 5, kind: input, shape index: {}]   ;;  %s3278_s6 = inlined_call_operand.vmem [shape: f32[2,1,64], index: 6, kind: input, shape index: {}]   ;;  %s3279_s7 = inlined_call_operand.vmem [shape: f32[2,1,64], index: 7, kind: input, shape index: {}]   ;;  %s3280_s8 = inlined_call_operand.vmem [shape: f32[2,1,64], index: 8, kind: input, shape index: {}]   ;;  %s3281_s9 = inlined_call_operand.vmem [shape: bf16[2,64,256], index: 9, kind: input, shape index: {}]   ;;  %s3282_s10 = inlined_call_operand.vmem [shape: f32[2,1,256], index: 10, kind: input, shape index: {}]   ;;  %s3283_s11 = inlined_call_operand.vmem [shape: bf16[2,256,64], index: 11, kind: input, shape index: {}]   ;;  %s3284_s12 = inlined_call_operand.vmem [shape: f32[2,1,64], index: 12, kind: input, shape index: {}]   ;;  %s3285_s13 = inlined_call_operand.hbm [shape: f32[2,8,64], index: 13, kind: output, shape index: {}]  }
   0x1   :  { %3303 = sst [smem:[#allocation20_spill]] %s3272_s0 }
   0x2   :  { %3304 = sst [smem:[#allocation21_spill]] %s3274_s2 }
   0x3   :  { %3305 = sst [smem:[#allocation22_spill]] %s3275_s3 }
   0x4   :  { %3306 = sst [smem:[#allocation23_spill]] %s3276_s4 }
   0x5   :  { %3307 = sst [smem:[#allocation24_spill]] %s3285_s13 }
   0x6   :  { %18 = vsyncpa [#allocation4], 0 }
   0x7   :  { %20 = vsyncpa [#allocation4 + $0x1], 0  ;;  %s2837_s25 = smov 0   ;;  %s2839_s26 = smov 0  }
   0x8   :  { %s2841_s27 = smov 0   ;;  %s2843_s28 = smov 0  }
   0x9   :  { %s2845_s29 = smov 0   ;;  %s2847_s30 = smov 0  }
   0xa   :  { %s2849_s14 = smov 0   ;;  %s2851_s15 = smov 0  }
   0xb LB: > { %3308 = sst [smem:[#allocation6_spill]] %s2731_s25  ;;  %s2234_s16 = sadd.s32 4294967295, %s2759_s15   ;;  %s2759_s15 = sphi %s2851_s15, %s26_s15   ;;  %s2755_s14 = sphi %s2849_s14, %s3351_s14   ;;  %s2751_s30 = sphi %s2847_s30, %s3350_s30   ;;  %s2747_s29 = sphi %s2845_s29, %s3349_s29   ;;  %s2743_s28 = sphi %s2843_s28, %s3348_s28   ;;  %s2739_s27 = sphi %s2841_s27, %s3347_s27   ;;  %s2735_s26 = sphi %s2839_s26, %s3346_s26   ;;  %s2731_s25 = sphi %s2837_s25, %s3345_s25  }
   0xc   : > { %3309 = sst [smem:[#allocation7_spill]] %s2735_s26  ;;  %s2235_s17 = sadd.s32 4294967294, %s2759_s15  }
   0xd   : > { %3310 = sst [smem:[#allocation8_spill]] %s2739_s27  ;;  %s35_s18 = sadd.s32 1, %s2751_s30 }
   0xe   : > { %3311 = sst [smem:[#allocation9_spill]] %s2743_s28  ;;  %s38_s19 = sadd.s32 1, %s2755_s14 }
   0xf   : > { %3312 = sst [smem:[#allocation10_spill]] %s2747_s29  ;;  %p36_p0 = scmp.ge.s32.totalorder %s35_s18, 2 }
  0x10   : > { %3313 = sst [smem:[#allocation11_spill]] %s2751_s30  ;;  %s383_s20 = sadd.s32 1, %s2739_s27 }
  0x11   : > { %3314 = sst [smem:[#allocation12_spill]] %s2755_s14  ;;  %p393_p1 = scmp.ne.s32.totalorder %s2739_s27, %s2735_s26 }
  0x12   : > { %3315 = sst [smem:[#allocation13_spill]] %s2759_s15  ;;  %p394_p2 = scmp.eq.s32.totalorder %s2234_s16, 3 }
  0x13   : > { %s3353_s18 = smov (%p36_p0, %s35_s18), 0  ;;  %s3355_s19 = smov (!%p36_p0, %s38_s19), %s2755_s14 }
  0x14   : > { %3316 = sst [smem:[#allocation14_spill]] %s3353_s18  ;;  %s380_s21 = ssub.s32 %s2751_s30, %s3353_s18 }
  0x15   : > { %p2889_p3 = por %p394_p2, %p393_p1  ;;  %p40_p4 = scmp.ge.s32.totalorder %s3355_s19, 2 }
  0x16   : > { %p381_p5 = scmp.eq.s32.totalorder %s380_s21, 0  ;;  %p399_p6 = scmp.ne.s32.totalorder %s2735_s26, %s2731_s25 }
  0x17   : > { %s3317_s22 = scalar_select %p2889_p3, 1, 0 }
  0x18   : > { %p400_p7 = scmp.eq.s32.totalorder %s2235_s17, 3  ;;  %s3357_s19 = smov (%p40_p4, %s3355_s19), 0 }
  0x19   : > { %3318 = sst [smem:[#allocation15_spill]] %s3317_s22  ;;  %p2238_p9 = scmp.ge.s32.totalorder %s2759_s15, 1 }
  0x1a   : > { %3319 = sst [smem:[#allocation16_spill]] %s3357_s19  ;;  %p2900_p8 = por %p400_p7, %p399_p6 }
  0x1b   : > { %s2898_s23 = scalar_select %p381_p5, %s2739_s27, %s383_s20  }
  0x1c   : > { %s3321_s24 = scalar_select %p2900_p8, 1, 0 }
  0x1d   : > { %3320 = sst [smem:[#allocation17_spill]] %s2898_s23  ;;  %p507_p10 = scmp.lt.s32.totalorder %s2759_s15, 5 }
  0x1e   : > { %3322 = sst [smem:[#allocation18_spill]] %s3321_s24 }
  0x1f   : > { %p508_p11 = pnand %p2238_p9, %p507_p10 }
  0x21   : > { %511 = sbr.rel (%p508_p11) target bundleno = 2379 (0x94b), region = 72 }
  0x26   : > { %s3288_s16 = sand.u32 1, %s2735_s26   ;;  %p596_p12 = scmp.lt.s32.totalorder %s2743_s28, 1 }
  0x27   : > { %s2910_s17 = sshll.u32 %s3288_s16, 3  ;;  %p600_p13 = scmp.lt.s32.totalorder %s2747_s29, 1 }
  0x28   : > { %s597_s20 = scalar_select %p596_p12, %s2743_s28, 1 }
  0x29   : > { %s2915_s21 = scalar_select %p600_p13, %s2747_s29, 1 }
  0x2a   : > { %s2240_s19 = sshll.u32 %s597_s20, 3  ;;  %s3323_s0 = sld [smem:[#allocation20_spill]] }
  0x2b   : > { %s2329_s13 = sshll.u32 %s2915_s21, 7  ;;  %s3325_s3 = sld [smem:[#allocation22_spill]] }
  0x2c   : > { %s2243_s20 = sshll.u32 %s2915_s21, 2  ;;  %s3326_s4 = sld [smem:[#allocation23_spill]] }
  0x2d   : > { %s2330_s30 = sshll.u32 %s2915_s21, 5  ;;  %s2248_s14 = sshll.u32 %s2915_s21, 1 }
  0x2e   : > { %s2944_s25 = scalar_lea.vmem %s3277_s5, %s2330_s30  ;;  %s2968_s15 = scalar_lea.vmem %s3282_s10, %s2248_s14 }
  0x2f   : > { %s595_s29 = scalar_lea.vmem [#allocation3], %s2910_s17  ;;  %s3328_s22 = sld [smem:[#allocation10_spill]] }
  0x30   : > { %s599_s16 = scalar_lea.vmem %s3323_s0, %s2240_s19  ;;  %s2973_s0 = scalar_lea.vmem %s3283_s11, %s2329_s13 }
  0x31   : > { %s2932_s28 = scalar_lea.vmem %s3325_s3, %s2329_s13  ;;  %s645_s3 = scalar_lea.vmem %s3284_s12, %s2915_s21 }
  0x32   : > { %s2938_s18 = scalar_lea.vmem %s3326_s4, %s2243_s20  ;;  %s2331_s20 = sshll.u32 %s2915_s21, 6 }
  0x33   : > { %3327 = sst [smem:[#allocation19_spill]] %s2938_s18  ;;  %s2963_s19 = scalar_lea.vmem %s3281_s9, %s2331_s20 }
  0x35   : > { %p2251_p0 = scmp.ne.s32.totalorder %s3328_s22, 0 }
  0x36   : > { %s3329_s4 = sld [smem:[#allocation9_spill]] (!%p2251_p0) }
  0x37   : > { %650 = sbr.rel (%p2251_p0) target bundleno = 63 (0x3f), region = 76 }
  0x3c   : > { %v651_v0 = vld [vmem:[%s599_s16] sm:$0xff]  ;;  %s2252_s18 = sshll.u32 %s3329_s4, 3  ;;  %vm654_vm0 = vcmask 523264  }
  0x3d   : > { %s653_s20 = scalar_lea.vmem [#allocation2], %s2252_s18 }
  0x3e   : > { %655 = vst.msk [vmem:[%s653_s20] sm:$0xff] %vm654_vm0, %v651_v0 }
  0x3f PF: > { %s3330_s14 = sld [smem:[#allocation9_spill]]  ;;  %vm661_vm1 = vcmask 523264   ;;  %v2595_v8 = vld [vmem:[%s2932_s28 + $0x18] sm:$0xff]   ;;  %v2761_v10 = vmov 0.0   ;;  %v2597_v11 = vld [vmem:[%s2932_s28 + $0x10] sm:$0xff]   ;;  %vm2762_vm2 = vmmov 0   ;;  %s3331_s30 = scalar_lea.vmem %s3273_s1, %s2915_s21 }
  0x40   : > { %v2596_v9 = vld [vmem:[%s2932_s28 + $0x38] sm:$0xff]   ;;  %2399 = vmatprep.subr.bf16.mxu0 %v2761_v10  ;;  %2411 = vmatprep.subr.bf16.mxu1 %v2761_v10  ;;  %v2598_v12 = vld [vmem:[%s2932_s28 + $0x30] sm:$0xff]   ;;  %v2599_v13 = vld [vmem:[%s2932_s28 + $0x8] sm:$0xff]   ;;  %s3332_s26 = sld [smem:[#allocation21_spill]]  ;;  %vm1017_vm3 = vcmask 130048   ;;  %vm1222_vm5 = vcmask 64512   ;;  %s3337_s24 = scalar_lea.vmem %s3280_s8, %s2915_s21 }
  0x41   : > { %2400 = vmatpush3.bf16.msra.mxu0 %v2595_v8  ;;  %2412 = vmatpush3.bf16.msra.mxu1 %v2596_v9  ;;  %v2600_v14 = vld [vmem:[%s2932_s28 + $0x28] sm:$0xff]   ;;  %v2601_v15 = vld [vmem:[%s2932_s28] sm:$0xff]   ;;  %v2603_v26 = vld [vmem:[%s2932_s28 + $0x58] sm:$0xff]   ;;  %s3334_s4 = sld [smem:[#allocation19_spill]]  ;;  %v1211_v8 = vlaneseq  ;;  %s2764_s18 = smov 96   ;;  %vm1276_vm6 = vcmask 1043456  }
  0x42   : > { %2401 = vmatprep.subr.bf16.mxu0 %v2761_v10  ;;  %2413 = vmatprep.subr.bf16.mxu1 %v2761_v10  ;;  %v2602_v16 = vld [vmem:[%s2932_s28 + $0x20] sm:$0xff]   ;;  %v2604_v27 = vld [vmem:[%s2932_s28 + $0x78] sm:$0xff]   ;;  %v2605_v29 = vld [vmem:[%s2932_s28 + $0x50] sm:$0xff]   ;;  %s3340_s20 = sld [smem:[#allocation24_spill]]  ;;  %s2766_s16 = smov [#allocation3]  }
  0x43   : > { %2407 = vmatprep.mubr.msk.bf16.mxu0 %vm2762_vm2, %v2761_v10  ;;  %2419 = vmatprep.mubr.msk.bf16.mxu1 %vm2762_vm2, %v2761_v10  ;;  %v2254_v21 = vld [vmem:[%s3331_s30] ss:$0 sm:$0xff]  ;;  %v2606_v30 = vld [vmem:[%s2932_s28 + $0x70] sm:$0xff]   ;;  %v2607_v31 = vld [vmem:[%s2932_s28 + $0x48] sm:$0xff]   ;;  %v3092_v9 = vshrl.u32 %v1211_v8, 7  ;;  %s3336_s30 = scalar_lea.vmem %s3279_s7, %s2915_s21  ;;  %s2671_s22 = sshll.u32 %s2766_s16, 4  ;;  %s2672_s22 = int_to_ptr.vmem [resolvable:$false] %s2671_s22 }
  0x44   : > { %v2608_v32 = vld [vmem:[%s2932_s28 + $0x68] sm:$0xff]   ;;  %v2609_v33 = vld [vmem:[%s2932_s28 + $0x40] sm:$0xff]  }
  0x45   : > { %s2253_s13 = sshll.u32 %s3330_s14, 3  ;;  %2402 = vmatpush3.bf16.msra.mxu0 %v2597_v11  ;;  %2414 = vmatpush3.bf16.msra.mxu1 %v2598_v12  ;;  %v2610_v34 = vld [vmem:[%s2932_s28 + $0x60] sm:$0xff]   ;;  %s2763_s28 = smov 112   ;;  %v1214_v11 = vand.u32 127, %v1211_v8 }
  0x46   : > { %s2983_s27 = scalar_lea.vmem [#allocation2], %s2253_s13  ;;  %2403 = vmatprep.subr.bf16.mxu0 %v2761_v10  ;;  %2415 = vmatprep.subr.bf16.mxu1 %v2761_v10  ;;  %s3333_s2 = scalar_lea.vmem %s3332_s26, %s2915_s21 }
  0x47   : > { %v2986_v1 = vld [vmem:[%s2983_s27] sm:$0xff]  ;;  %vm1215_vm4 = vcmp.le.s32.totalorder %v1214_v11, %v3092_v9  ;;  %s3335_s13 = scalar_lea.vmem %s3278_s6, %s2915_s21 }
  0x48   : > { %v662_v2 = vsel %vm661_vm1, %v2986_v1, 0.0  ;;  %v2255_v23 = vld [vmem:[%s3333_s2] ss:$0 sm:$0xff]  ;;  %v2257_v37 = vld [vmem:[%s3334_s4 + $0x1] ss:$0 sm:$0xff] }
  0x49   : > { %663 = vadd.xlane.f32.xlu0 %v662_v2  ;;  %2404 = vmatpush3.bf16.msra.mxu0 %v2599_v13  ;;  %v2256_v35 = vld [vmem:[%s3334_s4] ss:$0 sm:$0xff]  ;;  %v2258_v49 = vld [vmem:[%s3334_s4 + $0x2] ss:$0 sm:$0xff]  ;;  %v2259_v50 = vld [vmem:[%s3334_s4 + $0x3] ss:$0 sm:$0xff] }
  0x4a   : > { %2416 = vmatpush3.bf16.msra.mxu1 %v2600_v14  ;;  %2405 = vmatprep.subr.bf16.mxu0 %v2761_v10  ;;  %s2326_s4 = sshll.u32 %s3330_s14, 7 }
  0x4b   : > { %2417 = vmatprep.subr.bf16.mxu1 %v2761_v10 }
  0x4d   : > { %2406 = vmatpush3.bf16.msra.mxu0 %v2601_v15 }
  0x4e   : > { %2418 = vmatpush3.bf16.msra.mxu1 %v2602_v16  ;;  %2423 = vmatprep.subr.bf16.mxu0 %v2761_v10 }
  0x4f   : > { %2435 = vmatprep.subr.bf16.mxu1 %v2761_v10 }
  0xd2   : > { %v664_v3 = vpop.xlane.xlu0 %663 }
  0xd3   : > { %v666_v4 = vmul.f32 0.015625, %v664_v3 }
  0xd5   : > { %v667_v5 = vsub.f32 %v2986_v1, %v666_v4 }
  0xd7   : > { %v668_v6 = vmul.f32 %v667_v5, %v667_v5 }
  0xd9   : > { %v669_v7 = vsel %vm661_vm1, %v668_v6, 0.0 }
  0xda   : > { %670 = vadd.xlane.f32.xlu0 %v669_v7 }
 0x163   : > { %v671_v17 = vpop.xlane.xlu0 %670 }
 0x164   : > { %v672_v18 = vmul.f32 0.015625, %v671_v17 }
 0x166   : > { %v673_v19 = vadd.f32 1e-05, %v672_v18 }
 0x168   : > { %2643 = vrsqrt.f32 %v673_v19 }
 0x175   : > { %v2644_v20 = vpop.eup %2643 }
 0x176   : > { %v675_v22 = vmul.f32 %v2644_v20, %v667_v5 }
 0x178   : > { %v682_v24 = vmul.f32 %v2254_v21, %v675_v22 }
 0x17a   : > { %v689_v25 = vadd.f32 %v2255_v23, %v682_v24 }
 0x17c   : > { %v690_v28 = vpack.c.bf16 %v689_v25, %v689_v25 }
 0x17e   : > { %2408 = vmatmul.mubr.msk.bf16.vlgmr.msra.gmra.mxu0 %vm661_vm1, %v690_v28  ;;  %2420 = vmatmul.mubr.msk.bf16.vlgmr.msra.gmra.mxu1 %vm661_vm1, %v690_v28 }
 0x17f   : > { %2424 = vmatpush3.bf16.msra.mxu0 %v2603_v26  ;;  %2436 = vmatpush3.bf16.msra.mxu1 %v2604_v27 }
 0x180   : > { %2425 = vmatprep.subr.bf16.mxu0 %v2761_v10  ;;  %2437 = vmatprep.subr.bf16.mxu1 %v2761_v10 }
 0x181   : > { %2431 = vmatprep.mubr.msk.bf16.mxu0 %vm2762_vm2, %v2761_v10  ;;  %2443 = vmatprep.mubr.msk.bf16.mxu1 %vm2762_vm2, %v2761_v10 }
 0x183   : > { %2426 = vmatpush3.bf16.msra.mxu0 %v2605_v29  ;;  %2438 = vmatpush3.bf16.msra.mxu1 %v2606_v30 }
 0x184   : > { %2427 = vmatprep.subr.bf16.mxu0 %v2761_v10  ;;  %2439 = vmatprep.subr.bf16.mxu1 %v2761_v10 }
 0x187   : > { %2428 = vmatpush3.bf16.msra.mxu0 %v2607_v31  ;;  %2440 = vmatpush3.bf16.msra.mxu1 %v2608_v32 }
 0x188   : > { %2429 = vmatprep.subr.bf16.mxu0 %v2761_v10  ;;  %2441 = vmatprep.subr.bf16.mxu1 %v2761_v10 }
 0x18b   : > { %2430 = vmatpush3.bf16.msra.mxu0 %v2609_v33  ;;  %2442 = vmatpush3.bf16.msra.mxu1 %v2610_v34 }
 0x18c   : > { %2447 = vmatprep.subr.bf16.mxu0 %v2761_v10  ;;  %2465 = vmatprep.subr.bf16.mxu1 %v2761_v10 }
 0x18e   : > { %2432 = vmatmul.mubr.msk.bf16.vlgmr.msra.gmra.mxu0 %vm661_vm1, %v690_v28  ;;  %2444 = vmatmul.mubr.msk.bf16.vlgmr.msra.gmra.mxu1 %vm661_vm1, %v690_v28 }
 0x18f   : > { %2449 = vmatprep.mubr.msk.bf16.mxu0 %vm2762_vm2, %v2761_v10  ;;  %2467 = vmatprep.mubr.msk.bf16.mxu1 %vm2762_vm2, %v2761_v10 }
 0x23e   : > { %v812_v36 = vpop.f32.mrf.mxu0  ;;  %v876_v38 = vpop.f32.mrf.mxu1 }
 0x23f   : > { %v813_v39 = vadd.f32 %v2256_v35, %v812_v36  ;;  %v877_v43 = vadd.f32 %v2257_v37, %v876_v38 }
 0x240   : > { %v2409_v40 = vpop.f32.mrf.mxu0  ;;  %v2421_v41 = vpop.f32.mrf.mxu1 }
 0x241   : > { %v3054_v42 = vpack.c.bf16 %v813_v39, %v813_v39  ;;  %v3057_v48 = vpack.c.bf16 %v877_v43, %v877_v43 }
 0x242   : > { %v815_v44 = vpop.f32.mrf.mxu0  ;;  %v879_v45 = vpop.f32.mrf.mxu1 }
 0x243   : > { %1015 = vrot.lane.b32.xlu1 %v3054_v42, %s2763_s28 }
 0x244   : > { %v2410_v46 = vpop.f32.mrf.mxu0  ;;  %v2422_v47 = vpop.f32.mrf.mxu1 }
 0x247   : > { %1065 = vrot.lane.b32.xlu1 %v3057_v48, %s2763_s28 }
 0x24e   : > { %v940_v51 = vpop.f32.mrf.mxu0  ;;  %v1004_v52 = vpop.f32.mrf.mxu1 }
 0x24f   : > { %v941_v53 = vadd.f32 %v2258_v49, %v940_v51  ;;  %v1005_v54 = vadd.f32 %v2259_v50, %v1004_v52 }
 0x250   : > { %v2433_v55 = vpop.f32.mrf.mxu0  ;;  %v2445_v56 = vpop.f32.mrf.mxu1 }
 0x251   : > { %v3062_v57 = vpack.c.bf16 %v941_v53, %v941_v53  ;;  %v3064_v58 = vpack.c.bf16 %v1005_v54, %v1005_v54 }
 0x252   : > { %v943_v59 = vpop.f32.mrf.mxu0  ;;  %v1007_v60 = vpop.f32.mrf.mxu1 }
 0x253   : > { %1163 = vrot.lane.b32.xlu1 %v3064_v58, %s2763_s28  ;;  %1114 = vrot.lane.b32.xlu0 %v3062_v57, %s2763_s28  ;;  %s2034_s28 = sshll.u32 %s595_s29, 4  ;;  %s2035_s28 = int_to_ptr.vmem [resolvable:$true] %s2034_s28 }
 0x254   : > { %v2434_v61 = vpop.f32.mrf.mxu0  ;;  %v2446_v62 = vpop.f32.mrf.mxu1  ;;  %s2667_s14 = scalar_lea.vmem %s2035_s28, 128  ;;  %p2674_p5 = scmp.lt.s32.totalorder %s2035_s28, %s2672_s22 }
 0x255   : > { %p2668_p1 = scmp.ne.s32.totalorder %s2035_s28, %s2667_s14 }
 0x257   : > { %p2669_p2 = pnand %p2668_p1, %p2889_p3 }
 0x259   : > { %p2670_p4 = pneg %p2669_p2 }
 0x2b5   : > { %v1016_v63 = vpop.permute.xlu1 %1015 }
 0x2b6   : > { %v1022_v0 = vsel %vm1017_vm3, %v1016_v63, 0 }
 0x2b7   : > { %2448 = vmatpush3.bf16.xpose.msra.mxu0 %v1022_v0 }
 0x2b8   : > { %2453 = vmatprep.subr.bf16.mxu0 %v2761_v10 }
 0x2b9   : > { %v1066_v2 = vpop.permute.xlu1 %1065 }
 0x2ba   : > { %v1071_v3 = vsel %vm1017_vm3, %v1066_v2, 0 }
 0x2be   : > { %2450 = vmatmul.mubr.msk.bf16.vlgmr.msra.gmra.mxu0 %vm1017_vm3, %v3054_v42 }
 0x2bf   : > { %2454 = vmatpush3.bf16.xpose.msra.mxu0 %v1071_v3  ;;  %2455 = vmatprep.mubr.msk.bf16.mxu0 %vm2762_vm2, %v2761_v10 }
 0x2c0   : > { %2459 = vmatprep.subr.bf16.mxu0 %v2761_v10 }
 0x2c5   : > { %v1164_v4 = vpop.permute.xlu1 %1163  ;;  %v1115_v5 = vpop.permute.xlu0 %1114 }
 0x2c6   : > { %v1169_v6 = vsel %vm1017_vm3, %v1164_v4, 0  ;;  %v1120_v7 = vsel %vm1017_vm3, %v1115_v5, 0  ;;  %2456 = vmatmul.mubr.msk.bf16.vlgmr.msra.gmra.mxu0 %vm1017_vm3, %v3057_v48 }
 0x2c7   : > { %2466 = vmatpush3.bf16.xpose.msra.mxu1 %v1169_v6  ;;  %2460 = vmatpush3.bf16.xpose.msra.mxu0 %v1120_v7 }
 0x2c8   : > { %2461 = vmatprep.mubr.msk.bf16.mxu0 %vm2762_vm2, %v2761_v10  ;;  %2471 = vmatprep.subr.bf16.mxu0 %v2761_v10 }
 0x2c9   : > { %2477 = vmatprep.subr.bf16.mxu1 %v2761_v10 }
 0x2ce   : > { %2468 = vmatmul.mubr.msk.bf16.vlgmr.msra.gmra.mxu1 %vm1017_vm3, %v3064_v58  ;;  %2462 = vmatmul.mubr.msk.bf16.vlgmr.msra.gmra.mxu0 %vm1017_vm3, %v3062_v57 }
 0x2cf   : > { %2473 = vmatprep.mubr.msk.bf16.mxu0 %vm2762_vm2, %v2761_v10  ;;  %2479 = vmatprep.mubr.msk.bf16.mxu1 %vm2762_vm2, %v2761_v10 }
 0x37e   : > { %v1058_v12 = vpop.f32.mrf.mxu0 }
 0x37f   : > { %v1218_v13 = vsel %vm1215_vm4, %v1058_v12, -inf }
 0x380   : > { %v2451_v14 = vpop.f32.mrf.mxu0  ;;  %v1223_v15 = vsel %vm1222_vm5, %v1218_v13, -inf }
 0x381   : > { %1224 = vmax.xlane.f32.xlu1 %v1223_v15 }
 0x382   : > { %v1061_v16 = vpop.f32.mrf.mxu0 }
 0x384   : > { %v2452_v17 = vpop.f32.mrf.mxu0 }
 0x386   : > { %v1107_v18 = vpop.f32.mrf.mxu0 }
 0x387   : > { %v1219_v19 = vsel %vm1215_vm4, %v1107_v18, -inf }
 0x388   : > { %v2457_v20 = vpop.f32.mrf.mxu0  ;;  %v1226_v21 = vsel %vm1222_vm5, %v1219_v19, -inf }
 0x389   : > { %1227 = vmax.xlane.f32.xlu0 %v1226_v21  ;;  %v2612_v20 = vld [vmem:[%s2944_s25 + $0x8] sm:$0xff]  }
 0x38a   : > { %v1110_v22 = vpop.f32.mrf.mxu0 }
 0x38b   : > { %v2613_v22 = vld [vmem:[%s2944_s25 + $0x10] sm:$0xff]  }
 0x38c   : > { %v2458_v23 = vpop.f32.mrf.mxu0 }
 0x38e   : > { %v1205_v24 = vpop.f32.mrf.mxu1  ;;  %v1156_v25 = vpop.f32.mrf.mxu0 }
 0x38f   : > { %v1220_v26 = vsel %vm1215_vm4, %v1156_v25, -inf  ;;  %v1221_v30 = vsel %vm1215_vm4, %v1205_v24, -inf }
 0x390   : > { %v2469_v27 = vpop.f32.mrf.mxu1  ;;  %v2463_v28 = vpop.f32.mrf.mxu0  ;;  %v1229_v29 = vsel %vm1222_vm5, %v1220_v26, -inf  ;;  %v1232_v35 = vsel %vm1222_vm5, %v1221_v30, -inf }
 0x391   : > { %1230 = vmax.xlane.f32.xlu1 %v1229_v29  ;;  %v2614_v28 = vld [vmem:[%s2944_s25 + $0x18] sm:$0xff]  }
 0x392   : > { %v1208_v31 = vpop.f32.mrf.mxu1  ;;  %v1159_v32 = vpop.f32.mrf.mxu0 }
 0x394   : > { %v2470_v33 = vpop.f32.mrf.mxu1  ;;  %v2464_v34 = vpop.f32.mrf.mxu0 }
 0x395   : > { %1233 = vmax.xlane.f32.xlu1 %v1232_v35 }
 0x39f   : > { %1271 = vrot.lane.b32.xlu0 %v3054_v42, %s2764_s18 }
 0x3a6   : > { %1320 = vrot.lane.b32.xlu1 %v3057_v48, %s2764_s18 }
 0x40a   : > { %v1225_v36 = vpop.xlane.xlu1 %1224 }
 0x40b   : > { %v1235_v37 = vsub.f32 %v1218_v13, %v1225_v36 }
 0x40d   : > { %v1239_v38 = vmul.f32 1.442695, %v1235_v37 }
 0x40f   : > { %2645 = vpow2.f32 %v1239_v38 }
 0x412   : > { %v1228_v39 = vpop.xlane.xlu0 %1227 }
 0x413   : > { %v1236_v40 = vsub.f32 %v1219_v19, %v1228_v39  ;;  %v2611_v19 = vld [vmem:[%s2944_s25] sm:$0xff]  }
 0x415   : > { %v1241_v41 = vmul.f32 1.442695, %v1236_v40 }
 0x416   : > { %v1272_v43 = vpop.permute.xlu0 %1271 }
 0x417   : > { %2647 = vpow2.f32 %v1241_v41  ;;  %v1278_v44 = vsel %vm1276_vm6, %v1272_v43, 0 }
 0x418   : > { %2472 = vmatpush3.bf16.msra.mxu0 %v1278_v44 }
 0x419   : > { %2483 = vmatprep.subr.bf16.mxu0 %v2761_v10 }
 0x41a   : > { %v1231_v45 = vpop.xlane.xlu1 %1230 }
 0x41b   : > { %v1237_v42 = vsub.f32 %v1220_v26, %v1231_v45 }
 0x41c   : > { %v2646_v46 = vpop.eup %2645 }
 0x41d   : > { %v1243_v47 = vmul.f32 1.442695, %v1237_v42  ;;  %v1247_v48 = vsel %vm1222_vm5, %v2646_v46, 0.0 }
 0x41e   : > { %1248 = vadd.xlane.f32.xlu1 %v1247_v48  ;;  %v1234_v49 = vpop.xlane.xlu1 %1233 }
 0x41f   : > { %2649 = vpow2.f32 %v1243_v47  ;;  %v1238_v50 = vsub.f32 %v1221_v30, %v1234_v49 }
 0x421   : > { %v1245_v51 = vmul.f32 1.442695, %v1238_v50 }
 0x422   : > { %v1321_v52 = vpop.permute.xlu1 %1320 }
 0x423   : > { %2651 = vpow2.f32 %v1245_v51  ;;  %v1326_v53 = vsel %vm1276_vm6, %v1321_v52, 0 }
 0x424   : > { %v2648_v54 = vpop.eup %2647  ;;  %2478 = vmatpush3.bf16.msra.mxu1 %v1326_v53 }
 0x425   : > { %v1250_v55 = vsel %vm1222_vm5, %v2648_v54, 0.0  ;;  %2489 = vmatprep.subr.bf16.mxu1 %v2761_v10 }
 0x426   : > { %1251 = vadd.xlane.f32.xlu1 %v1250_v55 }
 0x42c   : > { %v2650_v56 = vpop.eup %2649 }
 0x42d   : > { %v1253_v59 = vsel %vm1222_vm5, %v2650_v56, 0.0 }
 0x42e   : > { %1254 = vadd.xlane.f32.xlu0 %v1253_v59 }
 0x430   : > { %v2652_v60 = vpop.eup %2651 }
 0x431   : > { %v1256_v61 = vsel %vm1222_vm5, %v2652_v60, 0.0 }
 0x432   : > { %1257 = vadd.xlane.f32.xlu1 %v1256_v61 }
 0x443   : > { %1368 = vrot.lane.b32.xlu1 %v3062_v57, %s2764_s18 }
 0x444   : > { %1416 = vrot.lane.b32.xlu0 %v3064_v58, %s2764_s18 }
 0x4a7   : > { %v1249_v62 = vpop.xlane.xlu1 %1248 }
 0x4a8   : > { %2653 = vrcp.f32 %v1249_v62  ;;  %v2296_v62 = vld [vmem:[%s3335_s13] ss:$0 sm:$0xff]  ;;  %s3219_s13 = scalar_lea.hbm %s3340_s20, %s2326_s4 }
 0x4af   : > { %v1252_v63 = vpop.xlane.xlu1 %1251 }
 0x4b0   : > { %2655 = vrcp.f32 %v1252_v63 }
 0x4b5   : > { %v2654_v0 = vpop.eup %2653 }
 0x4b6   : > { %v1260_v2 = vmul.f32 %v2654_v0, %v2646_v46 }
 0x4b7   : > { %v1255_v3 = vpop.xlane.xlu0 %1254 }
 0x4b8   : > { %2657 = vrcp.f32 %v1255_v3  ;;  %v1267_v4 = vpack.c.bf16 %v1260_v2, %v1260_v2 }
 0x4ba   : > { %2474 = vmatmul.mubr.msk.bf16.vlgmr.msra.gmra.mxu0 %vm1222_vm5, %v1267_v4 }
 0x4bb   : > { %v1258_v5 = vpop.xlane.xlu1 %1257  ;;  %2485 = vmatprep.mubr.msk.bf16.mxu0 %vm2762_vm2, %v2761_v10  ;;  %v1417_v7 = vpop.permute.xlu0 %1416 }
 0x4bc   : > { %2659 = vrcp.f32 %v1258_v5  ;;  %v1422_v12 = vsel %vm1276_vm6, %v1417_v7, 0 }
 0x4bd   : > { %v2656_v57 = vpop.eup %2655 }
 0x4be   : > { %v1262_v6 = vmul.f32 %v2656_v57, %v2648_v54 }
 0x4bf   : > { %v1369_v58 = vpop.permute.xlu1 %1368 }
 0x4c0   : > { %v1374_v8 = vsel %vm1276_vm6, %v1369_v58, 0  ;;  %v1268_v11 = vpack.c.bf16 %v1262_v6, %v1262_v6 }
 0x4c1   : > { %2484 = vmatpush3.bf16.msra.mxu0 %v1374_v8 }
 0x4c2   : > { %2480 = vmatmul.mubr.msk.bf16.vlgmr.msra.gmra.mxu1 %vm1222_vm5, %v1268_v11  ;;  %2495 = vmatprep.subr.bf16.mxu0 %v2761_v10 }
 0x4c3   : > { %2490 = vmatpush3.bf16.msra.mxu1 %v1422_v12  ;;  %2491 = vmatprep.mubr.msk.bf16.mxu1 %vm2762_vm2, %v2761_v10 }
 0x4c4   : > { %2501 = vmatprep.subr.bf16.mxu1 %v2761_v10 }
 0x4c5   : > { %v2658_v13 = vpop.eup %2657 }
 0x4c6   : > { %v1264_v14 = vmul.f32 %v2658_v13, %v2650_v56  ;;  %v2617_v13 = vld [vmem:[%s2963_s19 + $0x34] ss:$8 sps:$4 sm:$0xff]  }
 0x4c8   : > { %v1269_v15 = vpack.c.bf16 %v1264_v14, %v1264_v14  ;;  %v2615_v14 = vld [vmem:[%s2963_s19 + $0x30] ss:$8 sps:$4 sm:$0xff]  }
 0x4c9   : > { %v2660_v16 = vpop.eup %2659 }
 0x4ca   : > { %2486 = vmatmul.mubr.msk.bf16.vlgmr.msra.gmra.mxu0 %vm1222_vm5, %v1269_v15  ;;  %v1266_v17 = vmul.f32 %v2660_v16, %v2652_v60  ;;  %v2618_v15 = vld [vmem:[%s2963_s19 + $0x20] ss:$8 sps:$4 sm:$0xff]   ;;  %v2623_v16 = vld [vmem:[%s2963_s19 + $0x14] ss:$8 sps:$4 sm:$0xff]  }
 0x4cb   : > { %2497 = vmatprep.mubr.msk.bf16.mxu0 %vm2762_vm2, %v2761_v10  ;;  %2496 = vmatpush3.bf16.msra.mxu0 %v2611_v19  ;;  %v2624_v19 = vld [vmem:[%s2963_s19] ss:$8 sps:$4 sm:$0xff]  }
 0x4cc   : > { %v1270_v18 = vpack.c.bf16 %v1266_v17, %v1266_v17  ;;  %2507 = vmatprep.subr.bf16.mxu0 %v2761_v10  ;;  %v2621_v17 = vld [vmem:[%s2963_s19 + $0x10] ss:$8 sps:$4 sm:$0xff]  }
 0x4ce   : > { %2492 = vmatmul.mubr.msk.bf16.vlgmr.msra.gmra.mxu1 %vm1222_vm5, %v1270_v18  ;;  %v2626_v18 = vld [vmem:[%s2963_s19 + $0x4] ss:$8 sps:$4 sm:$0xff]  }
 0x4cf   : > { %2503 = vmatprep.mubr.msk.bf16.mxu1 %vm2762_vm2, %v2761_v10  ;;  %2502 = vmatpush3.bf16.msra.mxu1 %v2612_v20  ;;  %v2765_v20 = vmov 0  }
 0x4d0   : > { %2513 = vmatprep.subr.bf16.mxu1 %v2761_v10 }
 0x57a   : > { %v1314_v21 = vpop.f32.mrf.mxu0 }
 0x57b   : > { %v1464_v23 = vpack.c.bf16 %v1314_v21, %v1314_v21 }
 0x57c   : > { %v2475_v24 = vpop.f32.mrf.mxu0 }
 0x57d   : > { %2498 = vmatmul.mubr.msk.bf16.vlgmr.msra.gmra.mxu0 %vm1017_vm3, %v1464_v23 }
 0x57e   : > { %v1317_v25 = vpop.f32.mrf.mxu0  ;;  %2508 = vmatpush3.bf16.msra.mxu0 %v2613_v22  ;;  %2509 = vmatprep.mubr.msk.bf16.mxu0 %vm2762_vm2, %v2761_v10 }
 0x57f   : > { %1789 = vmatprep.subr.bf16.mxu0 %v2617_v13  ;;  %v2297_v25 = vld [vmem:[%s3336_s30] ss:$0 sm:$0xff]  ;;  %s2673_s30 = scalar_lea.vmem %s2672_s22, 256 }
 0x580   : > { %v2476_v26 = vpop.f32.mrf.mxu0  ;;  %p2675_p6 = scmp.lt.s32.totalorder %s2673_s30, %s2667_s14 }
 0x582   : > { %v1362_v27 = vpop.f32.mrf.mxu1  ;;  %p2676_p7 = por %p2675_p6, %p2674_p5 }
 0x583   : > { %v1465_v29 = vpack.c.bf16 %v1362_v27, %v1362_v27  ;;  %v2298_v27 = vld [vmem:[%s3337_s24] ss:$0 sm:$0xff] }
 0x584   : > { %v2481_v30 = vpop.f32.mrf.mxu1  ;;  %p2677_p9 = pnand %p2676_p7, %p2670_p4 }
 0x585   : > { %2504 = vmatmul.mubr.msk.bf16.vlgmr.msra.gmra.mxu1 %vm1017_vm3, %v1465_v29 }
 0x586   : > { %v1365_v31 = vpop.f32.mrf.mxu1  ;;  %2514 = vmatpush3.bf16.msra.mxu1 %v2614_v28  ;;  %2515 = vmatprep.mubr.msk.bf16.mxu1 %vm2762_vm2, %v2761_v10 }
 0x587   : > { %v2627_v31 = vld [vmem:[%s2973_s0 + $0x78] sm:$0xff]  }
 0x588   : > { %v2482_v32 = vpop.f32.mrf.mxu1  ;;  %2377 = vmatprep.subr.bf16.mxu1 %v2627_v31 }
 0x589   : > { %v2628_v32 = vld [vmem:[%s2973_s0 + $0x38] sm:$0xff]  }
 0x58a   : > { %v1410_v33 = vpop.f32.mrf.mxu0 }
 0x58b   : > { %v1466_v34 = vpack.c.bf16 %v1410_v33, %v1410_v33  ;;  %v2629_v33 = vld [vmem:[%s2973_s0 + $0x70] sm:$0xff]  }
 0x58c   : > { %v2487_v35 = vpop.f32.mrf.mxu0 }
 0x58d   : > { %2510 = vmatmul.mubr.msk.bf16.vlgmr.msra.gmra.mxu0 %vm1017_vm3, %v1466_v34  ;;  %v2630_v34 = vld [vmem:[%s2973_s0 + $0x30] sm:$0xff]   ;;  %v2631_v35 = vld [vmem:[%s2973_s0 + $0x68] sm:$0xff]  }
 0x58e   : > { %v1413_v36 = vpop.f32.mrf.mxu0  ;;  %v1458_v37 = vpop.f32.mrf.mxu1  ;;  %1790 = vmatpush1.bf16.msra.mxu0 %v2615_v14  ;;  %1813 = vmatprep.mubr.bf16.mxu0 %v2765_v20 }
 0x58f   : > { %v1467_v38 = vpack.c.bf16 %v1458_v37, %v1458_v37  ;;  %v2632_v36 = vld [vmem:[%s2973_s0 + $0x28] sm:$0xff]   ;;  %v2633_v37 = vld [vmem:[%s2973_s0 + $0x60] sm:$0xff]  }
 0x590   : > { %v2488_v39 = vpop.f32.mrf.mxu0  ;;  %v2493_v40 = vpop.f32.mrf.mxu1 }
 0x591   : > { %2516 = vmatmul.mubr.msk.bf16.vlgmr.msra.gmra.mxu1 %vm1017_vm3, %v1467_v38  ;;  %v2634_v38 = vld [vmem:[%s2973_s0 + $0x20] sm:$0xff]   ;;  %v2635_v39 = vld [vmem:[%s2973_s0 + $0x58] sm:$0xff]  }
 0x592   : > { %v1461_v41 = vpop.f32.mrf.mxu1  ;;  %2378 = vmatpush3.bf16.msra.mxu1 %v2628_v32  ;;  %v2636_v40 = vld [vmem:[%s2973_s0 + $0x18] sm:$0xff]  }
 0x593   : > { %2379 = vmatprep.subr.bf16.mxu1 %v2629_v33  ;;  %v2637_v41 = vld [vmem:[%s2973_s0 + $0x50] sm:$0xff]  }
 0x594   : > { %v2494_v43 = vpop.f32.mrf.mxu1 }
 0x595   : > { %v2638_v43 = vld [vmem:[%s2973_s0 + $0x10] sm:$0xff]  }
 0x596   : > { %2380 = vmatpush3.bf16.msra.mxu1 %v2630_v34 }
 0x597   : > { %2381 = vmatprep.subr.bf16.mxu1 %v2631_v35 }
 0x59a   : > { %2382 = vmatpush3.bf16.msra.mxu1 %v2632_v36 }
 0x59b   : > { %2383 = vmatprep.subr.bf16.mxu1 %v2633_v37 }
 0x59e   : > { %2384 = vmatpush3.bf16.msra.mxu1 %v2634_v38 }
 0x59f   : > { %2385 = vmatprep.subr.bf16.mxu1 %v2635_v39 }
 0x5a2   : > { %2386 = vmatpush3.bf16.msra.mxu1 %v2636_v40 }
 0x5a3   : > { %2387 = vmatprep.subr.bf16.mxu1 %v2637_v41 }
 0x5a6   : > { %2388 = vmatpush3.bf16.msra.mxu1 %v2638_v43 }
 0x63d   : > { %v1519_v44 = vpop.f32.mrf.mxu0 }
 0x63e   : > { %v1672_v52 = vsel %vm661_vm1, %v1519_v44, 0.0  ;;  %v2639_v44 = vld [vmem:[%s2973_s0 + $0x48] sm:$0xff]  }
 0x63f   : > { %v2499_v45 = vpop.f32.mrf.mxu0  ;;  %2389 = vmatprep.subr.bf16.mxu1 %v2639_v44 }
 0x640   : > { %v2640_v45 = vld [vmem:[%s2973_s0 + $0x8] sm:$0xff]  }
 0x641   : > { %v1522_v42 = vpop.f32.mrf.mxu0  ;;  %2390 = vmatpush3.bf16.msra.mxu1 %v2640_v45 }
 0x642   : > { %v2641_v42 = vld [vmem:[%s2973_s0 + $0x40] sm:$0xff]  }
 0x643   : > { %v2500_v10 = vpop.f32.mrf.mxu0  ;;  %2391 = vmatprep.subr.bf16.mxu1 %v2641_v42 }
 0x644   : > { %v2642_v10 = vld [vmem:[%s2973_s0] sm:$0xff]  }
 0x645   : > { %v1568_v46 = vpop.f32.mrf.mxu1  ;;  %2392 = vmatpush3.bf16.msra.mxu1 %v2642_v10 }
 0x646   : > { %v1673_v50 = vsel %vm661_vm1, %v1568_v46, 0.0  ;;  %v1730_v46 = vsub.s32 0, %v3092_v9 }
 0x647   : > { %v2505_v47 = vpop.f32.mrf.mxu1  ;;  %v1674_v54 = vadd.f32 %v1673_v50, %v1672_v52 }
 0x648   : > { %v1726_v47 = vld [vmem:[%s2968_s15] sm:$0x3]  ;;  %s3338_s15 = sld [smem:[#allocation7_spill]] }
 0x649   : > { %v1571_v48 = vpop.f32.mrf.mxu1 }
 0x64a   : > { %v1734_v48 = vsub.s32 1, %v3092_v9 }
 0x64b   : > { %v2506_v49 = vpop.f32.mrf.mxu1 }
 0x64c   : > { %v1731_v49 = vrot.slane %v1726_v47, %v1730_v46  ;;  %v1735_v50 = vrot.slane %v1726_v47, %v1734_v48 }
 0x64d   : > { %v1617_v51 = vpop.f32.mrf.mxu0 }
 0x64e   : > { %v1675_v53 = vsel %vm661_vm1, %v1617_v51, 0.0  ;;  %s3341_s21 = sand.u32 1, %s3338_s15  }
 0x64f   : > { %v2511_v55 = vpop.f32.mrf.mxu0  ;;  %v1676_v56 = vadd.f32 %v1675_v53, %v1674_v54 }
 0x651   : > { %v1620_v59 = vpop.f32.mrf.mxu0  ;;  %v1666_v60 = vpop.f32.mrf.mxu1 }
 0x652   : > { %v1677_v61 = vsel %vm661_vm1, %v1666_v60, 0.0 }
 0x653   : > { %v1678_v63 = vadd.f32 %v1677_v61, %v1676_v56  ;;  %v2512_v0 = vpop.f32.mrf.mxu0  ;;  %v2517_v2 = vpop.f32.mrf.mxu1 }
 0x655   : > { %v1686_v3 = vadd.f32 %v2296_v62, %v1678_v63  ;;  %v1669_v4 = vpop.f32.mrf.mxu1 }
 0x657   : > { %v2518_v5 = vpop.f32.mrf.mxu1  ;;  %v3163_v57 = vadd.f32 %v1686_v3, %v2986_v1  ;;  %v2620_v1 = vld [vmem:[%s2963_s19 + $0x24] ss:$8 sps:$4 sm:$0xff]  }
 0x658   : > { %1791 = vmatprep.subr.bf16.mxu0 %v2620_v1 }
 0x659   : > { %v1690_v6 = vsel %vm661_vm1, %v3163_v57, 0.0  ;;  %1792 = vmatpush1.bf16.msra.mxu0 %v2618_v15 }
 0x65a   : > { %1691 = vadd.xlane.f32.xlu1 %v1690_v6  ;;  %1793 = vmatprep.subr.bf16.mxu0 %v2623_v16  ;;  %v2308_v16 = vld [vmem:[%s645_s3] ss:$0 sm:$0xff]  ;;  %s2021_s3 = scalar_lea.sflag [#allocation4], %s3341_s21 }
 0x65d   : > { %1794 = vmatpush1.bf16.msra.mxu0 %v2621_v17 }
 0x65e   : > { %1795 = vmatprep.subr.bf16.mxu0 %v2626_v18 }
 0x661   : > { %1796 = vmatpush1.bf16.msra.mxu0 %v2624_v19 }
 0x6e3   : > { %v1692_v7 = vpop.xlane.xlu1 %1691 }
 0x6e4   : > { %v1693_v58 = vmul.f32 0.015625, %v1692_v7 }
 0x6e6   : > { %v1694_v8 = vsub.f32 %v3163_v57, %v1693_v58 }
 0x6e8   : > { %v1695_v11 = vmul.f32 %v1694_v8, %v1694_v8 }
 0x6ea   : > { %v1696_v12 = vsel %vm661_vm1, %v1695_v11, 0.0 }
 0x6eb   : > { %1697 = vadd.xlane.f32.xlu0 %v1696_v12 }
 0x774   : > { %v1698_v21 = vpop.xlane.xlu0 %1697 }
 0x775   : > { %v1699_v22 = vmul.f32 0.015625, %v1698_v21 }
 0x777   : > { %v1700_v23 = vadd.f32 1e-05, %v1699_v22 }
 0x779   : > { %2661 = vrsqrt.f32 %v1700_v23 }
 0x786   : > { %v2662_v24 = vpop.eup %2661 }
 0x787   : > { %v1702_v26 = vmul.f32 %v2662_v24, %v1694_v8 }
 0x789   : > { %v1709_v28 = vmul.f32 %v2297_v25, %v1702_v26 }
 0x78b   : > { %v1716_v29 = vadd.f32 %v2298_v27, %v1709_v28 }
 0x78d   : > { %v1717_v30 = vpack.c.bf16 %v1716_v29, %v1716_v29 }
 0x78f   : > { %2307 = vmatmul.mubr.msk.bf16.vlgmr.msra.gmra.mxu0 %vm661_vm1, %v1717_v30 }
 0x84f   : > { %v1815_v51 = vpop.f32.mrf.mxu0 }
 0x850   : > { %v1816_v52 = vadd.f32 %v1815_v51, %v1731_v49 }
 0x851   : > { %v1817_v53 = vpop.f32.mrf.mxu0 }
 0x852   : > { %v1822_v54 = vmul.f32 %v1816_v52, %v1816_v52  ;;  %v1818_v55 = vadd.f32 %v1817_v53, %v1735_v50 }
 0x853   : > { %v1819_v56 = vpop.f32.mrf.mxu0 }
 0x854   : > { %v1824_v59 = vmul.f32 %v1822_v54, %v1816_v52  ;;  %v1823_v60 = vmul.f32 %v1818_v55, %v1818_v55 }
 0x855   : > { %v1820_v61 = vpop.f32.mrf.mxu0 }
 0x856   : > { %v1826_v62 = vmul.f32 0.044715, %v1824_v59  ;;  %v1825_v63 = vmul.f32 %v1823_v60, %v1818_v55 }
 0x858   : > { %v1828_v0 = vadd.f32 %v1826_v62, %v1816_v52  ;;  %v1827_v2 = vmul.f32 0.044715, %v1825_v63 }
 0x85a   : > { %v1830_v3 = vmul.f32 0.7978846, %v1828_v0  ;;  %v1829_v4 = vadd.f32 %v1827_v2, %v1818_v55 }
 0x85c   : > { %2663 = vtanh.f32 %v1830_v3  ;;  %v1831_v9 = vmul.f32 0.7978846, %v1829_v4 }
 0x85e   : > { %2665 = vtanh.f32 %v1831_v9 }
 0x869   : > { %v2664_v5 = vpop.eup %2663 }
 0x86a   : > { %v1834_v6 = vadd.f32 1.0, %v2664_v5 }
 0x86b   : > { %v2666_v7 = vpop.eup %2665 }
 0x86c   : > { %v1835_v58 = vadd.f32 1.0, %v2666_v7  ;;  %v1836_v8 = vmul.f32 0.5, %v1834_v6 }
 0x86e   : > { %v1837_v11 = vmul.f32 0.5, %v1835_v58  ;;  %v1838_v12 = vmul.f32 %v1836_v8, %v1816_v52 }
 0x870   : > { %v1839_v13 = vmul.f32 %v1837_v11, %v1818_v55  ;;  %v1840_v1 = vpack.c.bf16 %v1838_v12, %v1838_v12 }
 0x872   : > { %v1841_v14 = vpack.c.bf16 %v1839_v13, %v1839_v13 }
 0x874   : > { %2009 = vmatprep.mubr.bf16.mxu1 %v1841_v14 }
 0x875   : > { %2010 = vmatmul.mubr.bf16.vlgmr.msra.gmra.mxu1 %v1840_v1 }
 0x935   : > { %v2393_v15 = vpop.f32.mrf.mxu1 }
 0x937   : > { %v2394_v17 = vpop.f32.mrf.mxu1 }
 0x938   : > { %v2395_v18 = vadd.f32 %v2394_v17, %v2393_v15 }
 0x939   : > { %v2396_v19 = vpop.f32.mrf.mxu1 }
 0x93a   : > { %v2012_v20 = vadd.f32 %v2395_v18, %v2308_v16 }
 0x93b   : > { %v2397_v21 = vpop.f32.mrf.mxu1 }
 0x93c   : > { %v2017_v22 = vadd.f32 %v2012_v20, %v3163_v57 }
 0x93e   : > { %2018 = vst.msk [vmem:[%s2983_s27] sm:$0xff] %vm661_vm1, %v2017_v22  ;;  %2019 = vst.msk [vmem:[%s595_s29] sm:$0xff] %vm661_vm1, %v2017_v22 }
 0x93f   : > { %2680 = shalt.err (!%p2677_p9)
}
 0x940   : > { %s2681_s17 = scalar_lea.hbm %s3219_s13, 128  ;;  %s2685_s19 = scalar_lea.hbm %s3340_s20, 256 }
 0x941   : > { %p2682_p10 = scmp.ne.s32.totalorder %s3219_s13, %s2681_s17  ;;  %p2686_p13 = scmp.lt.s32.totalorder %s3219_s13, %s3340_s20 }
 0x942   : > { %p2687_p0 = scmp.lt.s32.totalorder %s2685_s19, %s2681_s17 }
 0x943   : > { %p2683_p11 = pnand %p2682_p10, %p2889_p3 }
 0x944   : > { %p2688_p1 = por %p2687_p0, %p2686_p13 }
 0x945   : > { %p2684_p12 = pneg %p2683_p11 }
 0x947   : > { %p2689_p2 = pnand %p2688_p1, %p2684_p12 }
 0x949   : > { %2692 = shalt.err (!%p2689_p2)
}
 0x94a   : > { %2519 = dma.vmem_to_hbm [thread:$0]  (%p2889_p3), %s2035_s28, 128, %s3219_s13, %s2021_s3  }
 0x94b PF: > { %s3342_s15 = sld [smem:[#allocation13_spill]] }
 0x94c   : > { %s3343_s0 = sld [smem:[#allocation6_spill]] }
 0x951   : > { %p2525_p4 = scmp.ge.s32.totalorder %s3342_s15, 2 }
 0x952   : > { %s2046_s4 = sand.u32 1, %s3343_s0  }
 0x953   : > { %p2522_p5 = pnand %p2525_p4, %p2900_p8  ;;  %s2047_s18 = scalar_lea.sflag [#allocation4], %s2046_s4 }
 0x955   : > { %p2523_p6 = pneg %p2522_p5 }
 0x957   : > { %2726 = dma.done.wait (%p2523_p6), %s2047_s18, 128  }
 0x958   : > { %2728 = vsyncadd (%p2523_p6), %s2047_s18, 4294967168  ;;  %s26_s15 = sadd.s32 1, %s3342_s15   ;;  %s3345_s25 = sld [smem:[#allocation7_spill]] }
 0x959   : > { %p23_p7 = scmp.ge.s32.totalorder %s26_s15, 6   ;;  %s3346_s26 = sld [smem:[#allocation8_spill]] }
 0x95a   : > { %s3347_s27 = sld [smem:[#allocation17_spill]] }
 0x95b   : > { %s3348_s28 = sld [smem:[#allocation11_spill]]  ;;  %25 = sbr.rel (!%p23_p7) target bundleno = 11 (0xb), region = 149 }
 0x95c   : > { %s3349_s29 = sld [smem:[#allocation12_spill]] }
 0x95d   : > { %s3350_s30 = sld [smem:[#allocation14_spill]] }
 0x95e   : > { %s3351_s14 = sld [smem:[#allocation16_spill]] }
 0x960   :  { %2052 = vsyncpa [#allocation4], 1 }
 0x961   :  { %2054 = vsyncpa [#allocation4 + $0x1], 1 }

</bundles_post_ra>
